<compile_context>
chip_gen: v6e
topology: v6e:2x2x1
jax: 0.10.0
libtpu: 0.0.40
codegen_flags: <defaults>
</compile_context>

<pallas_src>
import functools

import jax
import jax.numpy as jnp
from jax.experimental import pallas as pl
from jax.experimental.pallas import tpu as pltpu

_VMEM_LIMIT = 64 * 1024 * 1024     # budget against v7x's 64 MiB physical VMEM


def _largest_divisor_leq(n, target):
    t = max(1, min(n, target))
    while n % t:
        t -= 1
    return t


def _to_phase(x, c_pad):
    """NHWC -> zero-padded, stride-2 phase-folded layout (bf16).

    ph[n, 2*r+s, a, b, :] == x_pad[n, 2*a + r, 2*b + s, :]  (x_pad = pad by 1).
    """
    N, H, W, C = x.shape
    Ho, Wo = H // 2, W // 2
    xp = jnp.pad(x, ((0, 0), (1, 1), (1, 1), (0, c_pad - C)))
    ph = jnp.transpose(xp.reshape(N, Ho + 1, 2, Wo + 1, 2, c_pad),
                       (0, 2, 4, 1, 3, 5)).reshape(N, 4, Ho + 1, Wo + 1, c_pad)
    return ph.astype(jnp.bfloat16)


# ============================================================================
# Kernel 1: fused 3x3 / stride-2 / pad-1 conv + bias + ReLU (+ 1x1 lateral).
#
# ph_body : (1, 4, tH, Wo+1, Cp)  bf16   phase-folded input, this row tile
# ph_halo : (1, 4, 1,  Wo+1, Cp)  bf16   one-row bottom halo of the same array
# w_ref   : (9*Cp, Cout)          bf16   conv weight, rows ordered (kh, kw, cin)
# b_ref   : (1, Cout)             f32
# [lw_ref : (Cout, Clat) bf16, lb_ref : (1, Clat) f32]
# [act_ref: (1, tH, Wo, Cout) bf16]      backbone activation (next layer input)
# [lat_ref: (1, tH, Wo, Clat) bf16]      lateral 1x1 output
# ============================================================================
def _conv3x3s2_relu_kernel(ph_body_ref, ph_halo_ref, w_ref, b_ref, *rest,
                           with_lat, with_act):
    if with_lat:
        lw_ref, lb_ref = rest[0], rest[1]
        outs = rest[2:]
    else:
        lw_ref = lb_ref = None
        outs = rest
    oi = 0
    act_ref = None
    if with_act:
        act_ref = outs[oi]
        oi += 1
    lat_ref = outs[oi] if with_lat else None

    _, _, tH, Wp, Cp = ph_body_ref.shape
    Wo = Wp - 1

    # VMEM-resident (4, tH+1, Wp, Cp) slab with the halo row appended; kept in
    # f32 so the 9-way lane-dim concat below uses the proven f32 concat path.
    full = jnp.concatenate([ph_body_ref[0], ph_halo_ref[0]],
                           axis=1).astype(jnp.float32)

    # Build the (tH*Wo, 9*Cp) im2col operand from 9 contiguous static slices
    # (no HBM im2col) and issue ONE MXU matmul with K = 9*Cp.
    taps = []
    for dh in range(3):
        r = dh % 2
        a0 = 1 if dh == 2 else 0        # phase-grid row offset
        for dw in range(3):
            s = dw % 2
            j0 = 1 if dw == 2 else 0    # phase-grid col offset
            taps.append(full[2 * r + s, a0:a0 + tH, j0:j0 + Wo, :])
    lhs = jnp.concatenate(taps, axis=-1).reshape(tH * Wo, 9 * Cp)

    acc = jnp.dot(lhs.astype(jnp.bfloat16), w_ref[...],
                  preferred_element_type=jnp.float32)
    act = jnp.maximum(acc + b_ref[...], 0.0)            # (tH*Wo, Cout) f32

    if with_act:
        cout = act.shape[-1]
        act_ref[0] = act.reshape(tH, Wo, cout).astype(act_ref.dtype)
    if with_lat:
        lat = jnp.dot(act.astype(jnp.bfloat16), lw_ref[...],
                      preferred_element_type=jnp.float32) + lb_ref[...]
        clat = lat.shape[-1]
        lat_ref[0] = lat.reshape(tH, Wo, clat).astype(lat_ref.dtype)


def conv3x3s2_relu(x, w, b, lat_w=None, lat_b=None, *, need_act=True,
                   row_tile_target=64):
    """3x3/s2/pad1 conv + bias + ReLU (NHWC), optionally fused 1x1 lateral.

    Returns (activation_or_None, lateral_or_None), both bf16 NHWC.
    """
    N, H, W, Cin = x.shape
    assert H % 2 == 0 and W % 2 == 0
    Ho, Wo = H // 2, W // 2
    Cout = w.shape[-1]
    assert w.shape[0] == 9 * Cin
    with_lat = lat_w is not None
    assert need_act or with_lat

    # Pad Cin up to a multiple of 8 (lane-friendly concat / MXU-K alignment);
    # padded channels get zero weights -> numerically identical.
    Cp = ((Cin + 7) // 8) * 8
    ph = _to_phase(x, Cp)                               # (N,4,Ho+1,Wo+1,Cp) bf16
    wk = w.astype(jnp.bfloat16).reshape(3, 3, Cin, Cout)
    if Cp != Cin:
        wk = jnp.pad(wk, ((0, 0), (0, 0), (0, Cp - Cin), (0, 0)))
    wk = wk.reshape(9 * Cp, Cout)

    tH = _largest_divisor_leq(Ho, row_tile_target)      # output rows per tile
    nT = Ho // tH
    Wp = Wo + 1

    in_specs = [
        pl.BlockSpec((1, 4, tH, Wp, Cp), lambda n, t: (n, 0, t, 0, 0)),
        pl.BlockSpec((1, 4, 1, Wp, Cp), lambda n, t: (n, 0, (t + 1) * tH, 0, 0)),
        pl.BlockSpec((9 * Cp, Cout), lambda n, t: (0, 0)),
        pl.BlockSpec((1, Cout), lambda n, t: (0, 0)),
    ]
    inputs = [ph, ph, wk, b]
    out_shape = []
    out_specs = []
    flops = 2 * N * Ho * Wo * 9 * Cp * Cout
    bytes_acc = 2 * ph.size * 2 + wk.size * 2 + b.size * 4
    if need_act:
        out_shape.append(jax.ShapeDtypeStruct((N, Ho, Wo, Cout), jnp.bfloat16))
        out_specs.append(pl.BlockSpec((1, tH, Wo, Cout),
                                      lambda n, t: (n, t, 0, 0)))
        bytes_acc += N * Ho * Wo * Cout * 2
    if with_lat:
        Clat = lat_w.shape[-1]
        in_specs += [pl.BlockSpec((Cout, Clat), lambda n, t: (0, 0)),
                     pl.BlockSpec((1, Clat), lambda n, t: (0, 0))]
        inputs += [lat_w.astype(jnp.bfloat16), lat_b]
        out_shape.append(jax.ShapeDtypeStruct((N, Ho, Wo, Clat), jnp.bfloat16))
        out_specs.append(pl.BlockSpec((1, tH, Wo, Clat),
                                      lambda n, t: (n, t, 0, 0)))
        flops += 2 * N * Ho * Wo * Cout * Clat
        bytes_acc += lat_w.size * 2 + lat_b.size * 4 + N * Ho * Wo * Clat * 2

    res = pl.pallas_call(
        functools.partial(_conv3x3s2_relu_kernel,
                          with_lat=with_lat, with_act=need_act),
        out_shape=tuple(out_shape),
        grid=(N, nT),
        in_specs=in_specs,
        out_specs=tuple(out_specs),
        compiler_params=pltpu.CompilerParams(
            dimension_semantics=("parallel", "parallel"),
            vmem_limit_bytes=_VMEM_LIMIT),
        cost_estimate=pl.CostEstimate(flops=int(flops), transcendentals=0,
                                      bytes_accessed=int(bytes_acc)),
    )(*inputs)

    act_out = None
    lat_out = None
    idx = 0
    if need_act:
        act_out = res[idx]
        idx += 1
    if with_lat:
        lat_out = res[idx]
    return act_out, lat_out


# ============================================================================
# Kernel 2: fused exact-2x bilinear upsample (align_corners=False) + add.
#
# x_ref : (1, h, w, C)        coarse level (bf16 or f32)
# y_ref : (1, 2h, w, 2C)      y with (even,odd) columns packed along lanes
#                             (a free, contiguity-preserving reshape of NHWC)
# o_ref : (1, 2h, w, 2C) f32  upsample(x) + y, same packed layout
#
# even output index 2k   : 0.75*x[k] + 0.25*x[k-1]  (clamped)
# odd  output index 2k+1 : 0.75*x[k] + 0.25*x[k+1]  (clamped)
# which matches F.interpolate(mode='bilinear', align_corners=False) at 2x.
# ============================================================================
def _upsample2x_add_kernel(x_ref, y_ref, o_ref):
    x = x_ref[...].astype(jnp.float32)                  # (1, h, w, C)
    _, h, w, C = x.shape
    # W-axis pass: clamped shifts done on the VMEM-resident block (no wrapper
    # edge-pad); even/odd output columns packed along the lane dim.
    left = jnp.concatenate([x[:, :, :1, :], x[:, :, :-1, :]], axis=2)
    right = jnp.concatenate([x[:, :, 1:, :], x[:, :, -1:, :]], axis=2)
    ev_w = 0.75 * x + 0.25 * left
    od_w = 0.75 * x + 0.25 * right
    u = jnp.concatenate([ev_w, od_w], axis=3)           # (1, h, w, 2C)
    # H-axis pass (leading-dim shifts with edge clamp).
    u_up = jnp.concatenate([u[:, :1], u[:, :-1]], axis=1)
    u_dn = jnp.concatenate([u[:, 1:], u[:, -1:]], axis=1)
    ev_h = 0.75 * u + 0.25 * u_up
    od_h = 0.75 * u + 0.25 * u_dn
    up = jnp.stack([ev_h, od_h], axis=2).reshape(1, 2 * h, w, 2 * C)
    o_ref[...] = (up + y_ref[...].astype(jnp.float32)).astype(o_ref.dtype)


def upsample_add(x, y):
    """Bilinear-upsample x (NHWC) 2x to y's spatial size and add y (fused)."""
    N, h, w, C = x.shape
    Ny, H2, W2, Cy = y.shape
    # TODO(synk): general F.interpolate target sizes are not implemented; the
    # stride-2 backbone used here guarantees an exact 2x ratio per level.
    assert Ny == N and Cy == C and H2 == 2 * h and W2 == 2 * w

    y2 = y.reshape(N, H2, w, 2 * C)                     # free reshape
    flops = 10 * N * H2 * w * 2 * C
    bytes_acc = (x.size * x.dtype.itemsize + y2.size * y2.dtype.itemsize
                 + N * H2 * w * 2 * C * 4)
    out = pl.pallas_call(
        _upsample2x_add_kernel,
        out_shape=jax.ShapeDtypeStruct((N, H2, w, 2 * C), jnp.float32),
        grid=(N,),
        in_specs=[
            pl.BlockSpec((1, h, w, C), lambda n: (n, 0, 0, 0)),
            pl.BlockSpec((1, H2, w, 2 * C), lambda n: (n, 0, 0, 0)),
        ],
        out_specs=pl.BlockSpec((1, H2, w, 2 * C), lambda n: (n, 0, 0, 0)),
        compiler_params=pltpu.CompilerParams(
            dimension_semantics=("parallel",),
            vmem_limit_bytes=_VMEM_LIMIT),
        cost_estimate=pl.CostEstimate(flops=int(flops), transcendentals=0,
                                      bytes_accessed=int(bytes_acc)),
    )(x, y2)
    return out.reshape(N, H2, 2 * w, C)                 # free reshape


# ============================================================================
# MultiFrameFPN forward.
# ============================================================================
def multiframe_fpn_forward(x_nchw, params, out_channels, lateral_channels,
                           return_layers):
    num_layers = len(out_channels)
    min_ret = min(return_layers)

    h = jnp.transpose(x_nchw, (0, 2, 3, 1)).astype(jnp.float32)   # NCHW->NHWC

    # Backbone (conv3x3/s2/pad1 + ReLU), lateral 1x1 fused into the same
    # kernel where needed.  The last layer's activation is never written to
    # HBM (only its lateral is consumed).
    lat = {}
    for i in range(num_layers):
        need_act = i < num_layers - 1
        with_lat = i >= min_ret
        act, lt = conv3x3s2_relu(
            h, params[f"conv{i}_w"], params[f"conv{i}_b"],
            params[f"lat{i}_w"] if with_lat else None,
            params[f"lat{i}_b"] if with_lat else None,
            need_act=need_act)
        if with_lat:
            lat[i] = lt
        h = act

    # Top-down pathway (fused upsample+add), outputs in f32.
    p = [lat[num_layers - 1]]
    for i in range(num_layers - 2, min_ret - 1, -1):
        p.append(upsample_add(p[-1], lat[i]))
    p = p[::-1]

    # Gather returned layers, back to NCHW (f32) for PyTorch parity.
    return [jnp.transpose(p[l - min_ret], (0, 3, 1, 2)).astype(jnp.float32)
            for l in return_layers]


# ============================================================================
# Params + pure-JAX reference (used only for the self-check in __main__).
# ============================================================================
def make_params(key, input_channels, out_channels, lateral_channels, min_ret):
    n = len(out_channels)
    cins = [input_channels] + list(out_channels[:-1])
    keys = jax.random.split(key, 4 * n)
    params = {}
    idx = 0
    for i in range(n):
        # NOTE: conv weight rows are ordered (kh, kw, cin); importing a real
        # PyTorch (Cout, Cin, 3, 3) kernel requires
        #   w.permute(2, 3, 1, 0).reshape(9 * Cin, Cout).
        params[f"conv{i}_w"] = (0.1 * jax.random.normal(
            keys[idx], (9 * cins[i], out_channels[i]),
            jnp.float32)).astype(jnp.bfloat16)
        params[f"conv{i}_b"] = 0.1 * jax.random.normal(
            keys[idx + 1], (1, out_channels[i]), jnp.float32)
        idx += 2
    for i in range(min_ret, n):
        params[f"lat{i}_w"] = (0.1 * jax.random.normal(
            keys[idx], (out_channels[i], lateral_channels),
            jnp.float32)).astype(jnp.bfloat16)
        params[f"lat{i}_b"] = 0.1 * jax.random.normal(
            keys[idx + 1], (1, lateral_channels), jnp.float32)
        idx += 2
    return params


def _ref_up2(x):
    """Exact-2x bilinear upsample (align_corners=False), NHWC, pure JAX."""
    def up_axis(v, axis, n):
        src = (jnp.arange(2 * n) + 0.5) / 2.0 - 0.5
        i0 = jnp.floor(src).astype(jnp.int32)
        frac = src - i0
        i0c = jnp.clip(i0, 0, n - 1)
        i1c = jnp.clip(i0 + 1, 0, n - 1)
        a = jnp.take(v, i0c, axis=axis)
        c = jnp.take(v, i1c, axis=axis)
        sh = [1] * v.ndim
        sh[axis] = 2 * n
        f = frac.reshape(sh)
        return a * (1.0 - f) + c * f
    N, h, w, C = x.shape
    return up_axis(up_axis(x, 1, h), 2, w)


def reference_forward(x_nchw, params, out_channels, lateral_channels,
                      return_layers):
    num_layers = len(out_channels)
    min_ret = min(return_layers)
    h = jnp.transpose(x_nchw, (0, 2, 3, 1)).astype(jnp.float32)
    c = []
    for i in range(num_layers):
        cin = h.shape[-1]
        w4 = params[f"conv{i}_w"].astype(jnp.float32).reshape(
            3, 3, cin, out_channels[i])
        h = jax.lax.conv_general_dilated(
            h, w4, window_strides=(2, 2), padding=((1, 1), (1, 1)),
            dimension_numbers=("NHWC", "HWIO", "NHWC"))
        h = jnp.maximum(h + params[f"conv{i}_b"].reshape(1, 1, 1, -1), 0.0)
        c.append(h)
    lat = {}
    for i in range(min_ret, num_layers):
        lat[i] = (jnp.einsum("nhwc,cd->nhwd", c[i],
                             params[f"lat{i}_w"].astype(jnp.float32))
                  + params[f"lat{i}_b"].reshape(1, 1, 1, -1))
    p = [lat[num_layers - 1]]
    for i in range(num_layers - 2, min_ret - 1, -1):
        p.append(_ref_up2(p[-1]) + lat[i])
    p = p[::-1]
    return [jnp.transpose(p[l - min_ret], (0, 3, 1, 2)) for l in return_layers]


if __name__ == "__main__":
    # Small config: 3 backbone stages, input (2, 3, 16, 16) NCHW.
    input_channels = 3
    out_channels = [8, 16, 32]
    lateral_channels = 16
    return_layers = list(range(len(out_channels) - 1))   # [0, 1], as in module
    min_ret = min(return_layers)

    key = jax.random.PRNGKey(0)
    k_params, k_x = jax.random.split(key)
    params = make_params(k_params, input_channels, out_channels,
                         lateral_channels, min_ret)
    x = jax.random.normal(k_x, (2, input_channels, 16, 16), jnp.float32)

    outs = multiframe_fpn_forward(x, params, out_channels, lateral_channels,
                                  return_layers)
    outs = [jax.block_until_ready(o) for o in outs]

    expected = [(2, lateral_channels, 8, 8), (2, lateral_channels, 4, 4)]
    assert [tuple(o.shape) for o in outs] == expected, \
        [tuple(o.shape) for o in outs]
    assert all(jnp.isfinite(o).all() for o in outs)

    # Numerical self-check against a pure-JAX f32 reference (same bf16-rounded
    # weights; tolerance covers the bf16 MXU-operand casts and bf16 storage of
    # intermediate activations / laterals).
    refs = reference_forward(x, params, out_channels, lateral_channels,
                             return_layers)
    for o, r in zip(outs, refs):
        err = float(jnp.max(jnp.abs(o - r)))
        assert err < 7e-2, f"max abs error {err}"

    print("KERNEL_OK")
</pallas_src>

<mosaic_0001>
module attributes {stable_mosaic.version = 11 : i64} {
  func.func @_conv3x3s2_relu_kernel(%arg0: i32, %arg1: i32, %arg2: memref<1x4x8x9x8xbf16, #tpu.memory_space<vmem>>, %arg3: memref<1x4x1x9x8xbf16, #tpu.memory_space<vmem>>, %arg4: memref<72x8xbf16, #tpu.memory_space<vmem>>, %arg5: memref<1x8xf32, #tpu.memory_space<vmem>>, %arg6: memref<8x16xbf16, #tpu.memory_space<vmem>>, %arg7: memref<1x16xf32, #tpu.memory_space<vmem>>, %arg8: memref<1x8x8x8xbf16, #tpu.memory_space<vmem>>, %arg9: memref<1x8x8x16xbf16, #tpu.memory_space<vmem>>) attributes {dimension_semantics = [#tpu.dimension_semantics<parallel>, #tpu.dimension_semantics<parallel>], iteration_bounds = array<i64: 2, 1>, scalar_prefetch = 0 : i64, scratch_operands = 0 : i64, tpu.core_type = #tpu.core_type<tc>, window_params = [{transform_indices = @transform_0, window_bounds = array<i64: 1, 4, 8, 9, 8>}, {transform_indices = @transform_1, window_bounds = array<i64: 1, 4, 1, 9, 8>}, {pipeline_mode = #tpu.pipeline_mode<synchronous>, transform_indices = @transform_2, window_bounds = array<i64: 72, 8>}, {pipeline_mode = #tpu.pipeline_mode<synchronous>, transform_indices = @transform_3, window_bounds = array<i64: 1, 8>}, {pipeline_mode = #tpu.pipeline_mode<synchronous>, transform_indices = @transform_4, window_bounds = array<i64: 8, 16>}, {pipeline_mode = #tpu.pipeline_mode<synchronous>, transform_indices = @transform_5, window_bounds = array<i64: 1, 16>}, {transform_indices = @transform_6, window_bounds = array<i64: 1, 8, 8, 8>}, {transform_indices = @transform_7, window_bounds = array<i64: 1, 8, 8, 16>}]} {
    %c0 = arith.constant 0 : index
    %c0_0 = arith.constant 0 : index
    %c0_1 = arith.constant 0 : index
    %c0_2 = arith.constant 0 : index
    %c0_3 = arith.constant 0 : index
    %0 = vector.load %arg2[%c0, %c0_0, %c0_1, %c0_2, %c0_3] : memref<1x4x8x9x8xbf16, #tpu.memory_space<vmem>>, vector<1x4x8x9x8xbf16>
    %1 = vector.shape_cast %0 : vector<1x4x8x9x8xbf16> to vector<4x8x9x8xbf16>
    %c0_4 = arith.constant 0 : index
    %c0_5 = arith.constant 0 : index
    %c0_6 = arith.constant 0 : index
    %c0_7 = arith.constant 0 : index
    %c0_8 = arith.constant 0 : index
    %2 = vector.load %arg3[%c0_4, %c0_5, %c0_6, %c0_7, %c0_8] : memref<1x4x1x9x8xbf16, #tpu.memory_space<vmem>>, vector<1x4x1x9x8xbf16>
    %3 = vector.shape_cast %2 : vector<1x4x1x9x8xbf16> to vector<4x1x9x8xbf16>
    %4 = tpu.concatenate %1, %3 in 1 : vector<4x8x9x8xbf16>, vector<4x1x9x8xbf16> -> vector<4x9x9x8xbf16>
    %5 = arith.extf %4 : vector<4x9x9x8xbf16> to vector<4x9x9x8xf32>
    %6 = vector.extract_strided_slice %5 {offsets = [0, 0, 0, 0], sizes = [1, 8, 8, 8], strides = [1, 1, 1, 1]} : vector<4x9x9x8xf32> to vector<1x8x8x8xf32>
    %7 = vector.shape_cast %6 : vector<1x8x8x8xf32> to vector<8x8x8xf32>
    %8 = vector.extract_strided_slice %5 {offsets = [1, 0, 0, 0], sizes = [1, 8, 8, 8], strides = [1, 1, 1, 1]} : vector<4x9x9x8xf32> to vector<1x8x8x8xf32>
    %9 = vector.shape_cast %8 : vector<1x8x8x8xf32> to vector<8x8x8xf32>
    %10 = vector.extract_strided_slice %5 {offsets = [0, 0, 1, 0], sizes = [1, 8, 8, 8], strides = [1, 1, 1, 1]} : vector<4x9x9x8xf32> to vector<1x8x8x8xf32>
    %11 = vector.shape_cast %10 : vector<1x8x8x8xf32> to vector<8x8x8xf32>
    %12 = vector.extract_strided_slice %5 {offsets = [2, 0, 0, 0], sizes = [1, 8, 8, 8], strides = [1, 1, 1, 1]} : vector<4x9x9x8xf32> to vector<1x8x8x8xf32>
    %13 = vector.shape_cast %12 : vector<1x8x8x8xf32> to vector<8x8x8xf32>
    %14 = vector.extract_strided_slice %5 {offsets = [3, 0, 0, 0], sizes = [1, 8, 8, 8], strides = [1, 1, 1, 1]} : vector<4x9x9x8xf32> to vector<1x8x8x8xf32>
    %15 = vector.shape_cast %14 : vector<1x8x8x8xf32> to vector<8x8x8xf32>
    %16 = vector.extract_strided_slice %5 {offsets = [2, 0, 1, 0], sizes = [1, 8, 8, 8], strides = [1, 1, 1, 1]} : vector<4x9x9x8xf32> to vector<1x8x8x8xf32>
    %17 = vector.shape_cast %16 : vector<1x8x8x8xf32> to vector<8x8x8xf32>
    %18 = vector.extract_strided_slice %5 {offsets = [0, 1, 0, 0], sizes = [1, 8, 8, 8], strides = [1, 1, 1, 1]} : vector<4x9x9x8xf32> to vector<1x8x8x8xf32>
    %19 = vector.shape_cast %18 : vector<1x8x8x8xf32> to vector<8x8x8xf32>
    %20 = vector.extract_strided_slice %5 {offsets = [1, 1, 0, 0], sizes = [1, 8, 8, 8], strides = [1, 1, 1, 1]} : vector<4x9x9x8xf32> to vector<1x8x8x8xf32>
    %21 = vector.shape_cast %20 : vector<1x8x8x8xf32> to vector<8x8x8xf32>
    %22 = vector.extract_strided_slice %5 {offsets = [0, 1, 1, 0], sizes = [1, 8, 8, 8], strides = [1, 1, 1, 1]} : vector<4x9x9x8xf32> to vector<1x8x8x8xf32>
    %23 = vector.shape_cast %22 : vector<1x8x8x8xf32> to vector<8x8x8xf32>
    %24 = tpu.concatenate %7, %9, %11, %13, %15, %17, %19, %21, %23 in 2 : vector<8x8x8xf32>, vector<8x8x8xf32>, vector<8x8x8xf32>, vector<8x8x8xf32>, vector<8x8x8xf32>, vector<8x8x8xf32>, vector<8x8x8xf32>, vector<8x8x8xf32>, vector<8x8x8xf32> -> vector<8x8x72xf32>
    %25 = vector.shape_cast %24 : vector<8x8x72xf32> to vector<64x72xf32>
    %26 = arith.truncf %25 : vector<64x72xf32> to vector<64x72xbf16>
    %c0_9 = arith.constant 0 : index
    %c0_10 = arith.constant 0 : index
    %27 = vector.load %arg4[%c0_9, %c0_10] : memref<72x8xbf16, #tpu.memory_space<vmem>>, vector<72x8xbf16>
    %cst = arith.constant dense<0.000000e+00> : vector<64x8xf32>
    %28 = tpu.matmul %26, %27, %cst {dimension_numbers = #tpu.dot_dimension_numbers<[1], [0], [0], [1], [0, 0, 1, 1], [], []>} : vector<64x72xbf16>, vector<72x8xbf16>, vector<64x8xf32> -> vector<64x8xf32>
    %c0_11 = arith.constant 0 : index
    %c0_12 = arith.constant 0 : index
    %29 = vector.load %arg5[%c0_11, %c0_12] : memref<1x8xf32, #tpu.memory_space<vmem>>, vector<1x8xf32>
    %30 = vector.broadcast %29 : vector<1x8xf32> to vector<64x8xf32>
    %31 = arith.addf %28, %30 : vector<64x8xf32>
    %cst_13 = arith.constant 0.000000e+00 : f32
    %32 = vector.broadcast %cst_13 : f32 to vector<64x8xf32>
    %33 = arith.maximumf %31, %32 : vector<64x8xf32>
    %34 = vector.shape_cast %33 : vector<64x8xf32> to vector<8x8x8xf32>
    %35 = arith.truncf %34 : vector<8x8x8xf32> to vector<8x8x8xbf16>
    %c0_14 = arith.constant 0 : index
    %c0_15 = arith.constant 0 : index
    %c0_16 = arith.constant 0 : index
    %c0_17 = arith.constant 0 : index
    %36 = vector.load %arg8[%c0_14, %c0_15, %c0_16, %c0_17] : memref<1x8x8x8xbf16, #tpu.memory_space<vmem>>, vector<1x8x8x8xbf16>
    %37 = vector.shape_cast %36 : vector<1x8x8x8xbf16> to vector<8x8x8xbf16>
    %38 = vector.shape_cast %35 : vector<8x8x8xbf16> to vector<1x8x8x8xbf16>
    tpu.vector_store %arg8[%c0_14, %c0_15, %c0_16, %c0_17], %38 {strides = array<i32>} : memref<1x8x8x8xbf16, #tpu.memory_space<vmem>>, vector<1x8x8x8xbf16>,
    %39 = arith.truncf %33 : vector<64x8xf32> to vector<64x8xbf16>
    %c0_18 = arith.constant 0 : index
    %c0_19 = arith.constant 0 : index
    %40 = vector.load %arg6[%c0_18, %c0_19] : memref<8x16xbf16, #tpu.memory_space<vmem>>, vector<8x16xbf16>
    %cst_20 = arith.constant dense<0.000000e+00> : vector<64x16xf32>
    %41 = tpu.matmul %39, %40, %cst_20 {dimension_numbers = #tpu.dot_dimension_numbers<[1], [0], [0], [1], [0, 0, 1, 1], [], []>} : vector<64x8xbf16>, vector<8x16xbf16>, vector<64x16xf32> -> vector<64x16xf32>
    %c0_21 = arith.constant 0 : index
    %c0_22 = arith.constant 0 : index
    %42 = vector.load %arg7[%c0_21, %c0_22] : memref<1x16xf32, #tpu.memory_space<vmem>>, vector<1x16xf32>
    %43 = vector.broadcast %42 : vector<1x16xf32> to vector<64x16xf32>
    %44 = arith.addf %41, %43 : vector<64x16xf32>
    %45 = vector.shape_cast %44 : vector<64x16xf32> to vector<8x8x16xf32>
    %46 = arith.truncf %45 : vector<8x8x16xf32> to vector<8x8x16xbf16>
    %c0_23 = arith.constant 0 : index
    %c0_24 = arith.constant 0 : index
    %c0_25 = arith.constant 0 : index
    %c0_26 = arith.constant 0 : index
    %47 = vector.load %arg9[%c0_23, %c0_24, %c0_25, %c0_26] : memref<1x8x8x16xbf16, #tpu.memory_space<vmem>>, vector<1x8x8x16xbf16>
    %48 = vector.shape_cast %47 : vector<1x8x8x16xbf16> to vector<8x8x16xbf16>
    %49 = vector.shape_cast %46 : vector<8x8x16xbf16> to vector<1x8x8x16xbf16>
    tpu.vector_store %arg9[%c0_23, %c0_24, %c0_25, %c0_26], %49 {strides = array<i32>} : memref<1x8x8x16xbf16, #tpu.memory_space<vmem>>, vector<1x8x8x16xbf16>,
    return
  }
  func.func @transform_0(%arg0: i32, %arg1: i32) -> (i32, i32, i32, i32, i32) {
    %c0_i32 = arith.constant 0 : i32
    %c0_i32_0 = arith.constant 0 : i32
    %c0_i32_1 = arith.constant 0 : i32
    %c0_i32_2 = arith.constant 0 : i32
    return %arg0, %c0_i32, %arg1, %c0_i32_0, %c0_i32_1 : i32, i32, i32, i32, i32
  }
  func.func @transform_1(%arg0: i32, %arg1: i32) -> (i32, i32, i32, i32, i32) {
    %c1_i32 = arith.constant 1 : i32
    %0 = arith.addi %arg1, %c1_i32 : i32
    %c8_i32 = arith.constant 8 : i32
    %1 = arith.muli %0, %c8_i32 : i32
    %c0_i32 = arith.constant 0 : i32
    %c0_i32_0 = arith.constant 0 : i32
    %c0_i32_1 = arith.constant 0 : i32
    %c0_i32_2 = arith.constant 0 : i32
    return %arg0, %c0_i32, %1, %c0_i32_0, %c0_i32_1 : i32, i32, i32, i32, i32
  }
  func.func @transform_2(%arg0: i32, %arg1: i32) -> (i32, i32) {
    %c0_i32 = arith.constant 0 : i32
    %c0_i32_0 = arith.constant 0 : i32
    %c0_i32_1 = arith.constant 0 : i32
    return %c0_i32, %c0_i32_0 : i32, i32
  }
  func.func @transform_3(%arg0: i32, %arg1: i32) -> (i32, i32) {
    %c0_i32 = arith.constant 0 : i32
    %c0_i32_0 = arith.constant 0 : i32
    %c0_i32_1 = arith.constant 0 : i32
    return %c0_i32, %c0_i32_0 : i32, i32
  }
  func.func @transform_4(%arg0: i32, %arg1: i32) -> (i32, i32) {
    %c0_i32 = arith.constant 0 : i32
    %c0_i32_0 = arith.constant 0 : i32
    %c0_i32_1 = arith.constant 0 : i32
    return %c0_i32, %c0_i32_0 : i32, i32
  }
  func.func @transform_5(%arg0: i32, %arg1: i32) -> (i32, i32) {
    %c0_i32 = arith.constant 0 : i32
    %c0_i32_0 = arith.constant 0 : i32
    %c0_i32_1 = arith.constant 0 : i32
    return %c0_i32, %c0_i32_0 : i32, i32
  }
  func.func @transform_6(%arg0: i32, %arg1: i32) -> (i32, i32, i32, i32) {
    %c0_i32 = arith.constant 0 : i32
    %c0_i32_0 = arith.constant 0 : i32
    %c0_i32_1 = arith.constant 0 : i32
    return %arg0, %arg1, %c0_i32, %c0_i32_0 : i32, i32, i32, i32
  }
  func.func @transform_7(%arg0: i32, %arg1: i32) -> (i32, i32, i32, i32) {
    %c0_i32 = arith.constant 0 : i32
    %c0_i32_0 = arith.constant 0 : i32
    %c0_i32_1 = arith.constant 0 : i32
    return %arg0, %arg1, %c0_i32, %c0_i32_0 : i32, i32, i32, i32
  }
}

</mosaic_0001>

<bundles_post_ra>
// kernel: tpu_custom_call.1
= control target key start
LH: loop header
LB: loop body
LE: loop exit
PB: predicated region body
PF: predicated region fallthrough
CT: control target
= control target key end

     0   :  { %13 = vsyncpa [#allocation5], 0  ;;  %s3015_s0 = inlined_call_operand.vmem [shape: bf16[2,4,9,9,8], index: 0, kind: input, shape index: {}]   ;;  %s3016_s1 = inlined_call_operand.vmem [shape: bf16[2,4,9,9,8], index: 1, kind: input, shape index: {}]   ;;  %s3017_s2 = inlined_call_operand.vmem [shape: bf16[72,8], index: 2, kind: input, shape index: {}]   ;;  %s3018_s3 = inlined_call_operand.vmem [shape: f32[1,8], index: 3, kind: input, shape index: {}]   ;;  %s3019_s4 = inlined_call_operand.vmem [shape: bf16[8,16], index: 4, kind: input, shape index: {}]   ;;  %s3020_s5 = inlined_call_operand.vmem [shape: f32[1,16], index: 5, kind: input, shape index: {}]   ;;  %s3021_s6 = inlined_call_operand.hbm [shape: bf16[2,8,8,8], index: 6, kind: output, shape index: {0}]   ;;  %s3022_s7 = inlined_call_operand.hbm [shape: bf16[2,8,8,16], index: 7, kind: output, shape index: {1}]  }
   0x1   :  { %15 = vsyncpa [#allocation5 + $0x1], 0 }
   0x2   :  { %16 = vsyncpa [#allocation7], 0 }
   0x3   :  { %18 = vsyncpa [#allocation7 + $0x1], 0  ;;  %s2352_s24 = smov 0   ;;  %s2354_s25 = smov 0  }
   0x4   :  { %s2356_s26 = smov 0   ;;  %s2358_s27 = smov 0  }
   0x5   :  { %s2360_s28 = smov 0   ;;  %s2362_s29 = smov 0  }
   0x6 LB: > { %s1808_s30 = sadd.s32 4294967295, %s2295_s29   ;;  %s1809_s8 = sadd.s32 4294967294, %s2295_s29   ;;  %s2295_s29 = sphi %s2362_s29, %s24_s29   ;;  %s2291_s28 = sphi %s2360_s28, %s3041_s28   ;;  %s2287_s27 = sphi %s2358_s27, %s3040_s27   ;;  %s2283_s26 = sphi %s2356_s26, %s3039_s26   ;;  %s2279_s25 = sphi %s2354_s25, %s3038_s25   ;;  %s2275_s24 = sphi %s2352_s24, %s3037_s24  }
   0x7   : > { %s36_s9 = sadd.s32 1, %s2291_s28  ;;  %s45_s10 = sadd.s32 1, %s2283_s26 }
   0x8   : > { %p38_p0 = scmp.ge.s32.totalorder %s36_s9, 2  ;;  %p52_p1 = scmp.ne.s32.totalorder %s2283_s26, %s2279_s25 }
   0x9   : > { %p53_p2 = scmp.eq.s32.totalorder %s2295_s29, 0  ;;  %p200_p3 = scmp.eq.s32.totalorder %s1808_s30, 1 }
   0xa   : > { %s3043_s9 = smov (%p38_p0, %s36_s9), 0  ;;  %p205_p6 = scmp.ne.s32.totalorder %s2279_s25, %s2275_s24 }
   0xb   : > { %p2391_p4 = por %p53_p2, %p52_p1  ;;  %p2395_p5 = por %p200_p3, %p52_p1 }
   0xc   : > { %s40_s13 = ssub.s32 %s2291_s28, %s3043_s9  ;;  %p206_p8 = scmp.eq.s32.totalorder %s1809_s8, 1 }
   0xd   : > { %p43_p7 = scmp.eq.s32.totalorder %s40_s13, 0  ;;  %p1811_p10 = scmp.ge.s32.totalorder %s2295_s29, 2 }
   0xe   : > { %p2406_p9 = por %p206_p8, %p205_p6 }
   0xf   : > { %s2404_s14 = scalar_select %p43_p7, %s2283_s26, %s45_s10  }
  0x10   : > { %262 = sbr.rel (%p1811_p10) target bundleno = 82 (0x52), region = 32 }
  0x15   : > { %265 = sbr.rel (!%p2391_p4) target bundleno = 75 (0x4b), region = 36  ;;  %s267_s16 = sand.u32 (%p2391_p4), 1, %s2283_s26  }
  0x16   : > { %s1906_s17 = smul.u32 (%p2391_p4), 288, %s2291_s28  ;;  %s1812_s18 = sshll.u32 (%p2391_p4), %s267_s16, 8 }
  0x17   : > { %s2422_s22 = scalar_lea.vmem (%p2391_p4), [#allocation2], %s1812_s18   ;;  %s2424_s23 = smov (%p2391_p4), 0  }
  0x18   : > { %s2420_s21 = scalar_lea.vmem (%p2391_p4), %s3015_s0, %s1906_s17  }
  0x1a LB: >> { %v302_v0 = vld [vmem:[%s2420_s21] sm:$0xf]  ;;  %v304_v1 = vld [vmem:[%s2420_s21 + $0x4] sm:$0xf]  ;;  %v306_v2 = vld [vmem:[%s2420_s21 + $0x8] sm:$0xf]  ;;  %s2299_s23 = sphi %s2424_s23, %s296_s23  }
  0x1b   : >> { %303 = vst [vmem:[%s2422_s22] sm:$0xf] %v302_v0  ;;  %305 = vst [vmem:[%s2422_s22 + $0x4] sm:$0xf] %v304_v1  ;;  %v308_v3 = vld [vmem:[%s2420_s21 + $0xc] sm:$0xf]  ;;  %s296_s23 = sadd.s32 1, %s2299_s23  }
  0x1c   : >> { %307 = vst [vmem:[%s2422_s22 + $0x8] sm:$0xf] %v306_v2  ;;  %v310_v4 = vld [vmem:[%s2420_s21 + $0x10] sm:$0xf]  ;;  %v312_v5 = vld [vmem:[%s2420_s21 + $0x14] sm:$0xf] }
  0x1d   : >> { %309 = vst [vmem:[%s2422_s22 + $0xc] sm:$0xf] %v308_v3  ;;  %311 = vst [vmem:[%s2422_s22 + $0x10] sm:$0xf] %v310_v4  ;;  %v314_v6 = vld [vmem:[%s2420_s21 + $0x18] sm:$0xf] }
  0x1e   : >> { %313 = vst [vmem:[%s2422_s22 + $0x14] sm:$0xf] %v312_v5  ;;  %v316_v7 = vld [vmem:[%s2420_s21 + $0x1c] sm:$0xf]  ;;  %v318_v8 = vld [vmem:[%s2420_s21 + $0x20] sm:$0xf] }
  0x1f   : >> { %315 = vst [vmem:[%s2422_s22 + $0x18] sm:$0xf] %v314_v6  ;;  %317 = vst [vmem:[%s2422_s22 + $0x1c] sm:$0xf] %v316_v7  ;;  %v320_v9 = vld [vmem:[%s2420_s21 + $0x24] sm:$0xf] }
  0x20   : >> { %319 = vst [vmem:[%s2422_s22 + $0x20] sm:$0xf] %v318_v8  ;;  %v322_v10 = vld [vmem:[%s2420_s21 + $0x28] sm:$0xf]  ;;  %v324_v11 = vld [vmem:[%s2420_s21 + $0x2c] sm:$0xf] }
  0x21   : >> { %321 = vst [vmem:[%s2422_s22 + $0x24] sm:$0xf] %v320_v9  ;;  %323 = vst [vmem:[%s2422_s22 + $0x28] sm:$0xf] %v322_v10  ;;  %v326_v12 = vld [vmem:[%s2420_s21 + $0x30] sm:$0xf] }
  0x22   : >> { %325 = vst [vmem:[%s2422_s22 + $0x2c] sm:$0xf] %v324_v11  ;;  %v328_v13 = vld [vmem:[%s2420_s21 + $0x34] sm:$0xf]  ;;  %v330_v14 = vld [vmem:[%s2420_s21 + $0x38] sm:$0xf] }
  0x23   : >> { %327 = vst [vmem:[%s2422_s22 + $0x30] sm:$0xf] %v326_v12  ;;  %329 = vst [vmem:[%s2422_s22 + $0x34] sm:$0xf] %v328_v13  ;;  %v332_v15 = vld [vmem:[%s2420_s21 + $0x3c] sm:$0xf] }
  0x24   : >> { %331 = vst [vmem:[%s2422_s22 + $0x38] sm:$0xf] %v330_v14  ;;  %v334_v16 = vld [vmem:[%s2420_s21 + $0x48] sm:$0xf]  ;;  %v336_v17 = vld [vmem:[%s2420_s21 + $0x4c] sm:$0xf] }
  0x25   : >> { %333 = vst [vmem:[%s2422_s22 + $0x3c] sm:$0xf] %v332_v15  ;;  %335 = vst [vmem:[%s2422_s22 + $0x40] sm:$0xf] %v334_v16  ;;  %v338_v18 = vld [vmem:[%s2420_s21 + $0x50] sm:$0xf] }
  0x26   : >> { %337 = vst [vmem:[%s2422_s22 + $0x44] sm:$0xf] %v336_v17  ;;  %v340_v19 = vld [vmem:[%s2420_s21 + $0x54] sm:$0xf]  ;;  %v342_v20 = vld [vmem:[%s2420_s21 + $0x58] sm:$0xf] }
  0x27   : >> { %339 = vst [vmem:[%s2422_s22 + $0x48] sm:$0xf] %v338_v18  ;;  %341 = vst [vmem:[%s2422_s22 + $0x4c] sm:$0xf] %v340_v19  ;;  %v344_v21 = vld [vmem:[%s2420_s21 + $0x5c] sm:$0xf] }
  0x28   : >> { %343 = vst [vmem:[%s2422_s22 + $0x50] sm:$0xf] %v342_v20  ;;  %v346_v22 = vld [vmem:[%s2420_s21 + $0x60] sm:$0xf]  ;;  %v348_v23 = vld [vmem:[%s2420_s21 + $0x64] sm:$0xf] }
  0x29   : >> { %345 = vst [vmem:[%s2422_s22 + $0x54] sm:$0xf] %v344_v21  ;;  %347 = vst [vmem:[%s2422_s22 + $0x58] sm:$0xf] %v346_v22  ;;  %v350_v24 = vld [vmem:[%s2420_s21 + $0x68] sm:$0xf] }
  0x2a   : >> { %349 = vst [vmem:[%s2422_s22 + $0x5c] sm:$0xf] %v348_v23  ;;  %v352_v25 = vld [vmem:[%s2420_s21 + $0x6c] sm:$0xf]  ;;  %v354_v26 = vld [vmem:[%s2420_s21 + $0x70] sm:$0xf] }
  0x2b   : >> { %351 = vst [vmem:[%s2422_s22 + $0x60] sm:$0xf] %v350_v24  ;;  %353 = vst [vmem:[%s2422_s22 + $0x64] sm:$0xf] %v352_v25  ;;  %v356_v27 = vld [vmem:[%s2420_s21 + $0x74] sm:$0xf] }
  0x2c   : >> { %355 = vst [vmem:[%s2422_s22 + $0x68] sm:$0xf] %v354_v26  ;;  %v358_v28 = vld [vmem:[%s2420_s21 + $0x78] sm:$0xf]  ;;  %v360_v29 = vld [vmem:[%s2420_s21 + $0x7c] sm:$0xf] }
  0x2d   : >> { %357 = vst [vmem:[%s2422_s22 + $0x6c] sm:$0xf] %v356_v27  ;;  %359 = vst [vmem:[%s2422_s22 + $0x70] sm:$0xf] %v358_v28  ;;  %v362_v30 = vld [vmem:[%s2420_s21 + $0x80] sm:$0xf] }
  0x2e   : >> { %361 = vst [vmem:[%s2422_s22 + $0x74] sm:$0xf] %v360_v29  ;;  %v364_v31 = vld [vmem:[%s2420_s21 + $0x84] sm:$0xf]  ;;  %v366_v32 = vld [vmem:[%s2420_s21 + $0x90] sm:$0xf] }
  0x2f   : >> { %363 = vst [vmem:[%s2422_s22 + $0x78] sm:$0xf] %v362_v30  ;;  %365 = vst [vmem:[%s2422_s22 + $0x7c] sm:$0xf] %v364_v31  ;;  %v368_v33 = vld [vmem:[%s2420_s21 + $0x94] sm:$0xf] }
  0x30   : >> { %367 = vst [vmem:[%s2422_s22 + $0x80] sm:$0xf] %v366_v32  ;;  %v370_v34 = vld [vmem:[%s2420_s21 + $0x98] sm:$0xf]  ;;  %v372_v35 = vld [vmem:[%s2420_s21 + $0x9c] sm:$0xf] }
  0x31   : >> { %369 = vst [vmem:[%s2422_s22 + $0x84] sm:$0xf] %v368_v33  ;;  %371 = vst [vmem:[%s2422_s22 + $0x88] sm:$0xf] %v370_v34  ;;  %v374_v36 = vld [vmem:[%s2420_s21 + $0xa0] sm:$0xf] }
  0x32   : >> { %373 = vst [vmem:[%s2422_s22 + $0x8c] sm:$0xf] %v372_v35  ;;  %v376_v37 = vld [vmem:[%s2420_s21 + $0xa4] sm:$0xf]  ;;  %v378_v38 = vld [vmem:[%s2420_s21 + $0xa8] sm:$0xf] }
  0x33   : >> { %375 = vst [vmem:[%s2422_s22 + $0x90] sm:$0xf] %v374_v36  ;;  %377 = vst [vmem:[%s2422_s22 + $0x94] sm:$0xf] %v376_v37  ;;  %v380_v39 = vld [vmem:[%s2420_s21 + $0xac] sm:$0xf] }
  0x34   : >> { %379 = vst [vmem:[%s2422_s22 + $0x98] sm:$0xf] %v378_v38  ;;  %v382_v40 = vld [vmem:[%s2420_s21 + $0xb0] sm:$0xf]  ;;  %v384_v41 = vld [vmem:[%s2420_s21 + $0xb4] sm:$0xf] }
  0x35   : >> { %381 = vst [vmem:[%s2422_s22 + $0x9c] sm:$0xf] %v380_v39  ;;  %383 = vst [vmem:[%s2422_s22 + $0xa0] sm:$0xf] %v382_v40  ;;  %v386_v42 = vld [vmem:[%s2420_s21 + $0xb8] sm:$0xf] }
  0x36   : >> { %385 = vst [vmem:[%s2422_s22 + $0xa4] sm:$0xf] %v384_v41  ;;  %v388_v43 = vld [vmem:[%s2420_s21 + $0xbc] sm:$0xf]  ;;  %v390_v44 = vld [vmem:[%s2420_s21 + $0xc0] sm:$0xf] }
  0x37   : >> { %387 = vst [vmem:[%s2422_s22 + $0xa8] sm:$0xf] %v386_v42  ;;  %389 = vst [vmem:[%s2422_s22 + $0xac] sm:$0xf] %v388_v43  ;;  %v392_v45 = vld [vmem:[%s2420_s21 + $0xc4] sm:$0xf] }
  0x38   : >> { %391 = vst [vmem:[%s2422_s22 + $0xb0] sm:$0xf] %v390_v44  ;;  %v394_v46 = vld [vmem:[%s2420_s21 + $0xc8] sm:$0xf]  ;;  %v396_v47 = vld [vmem:[%s2420_s21 + $0xcc] sm:$0xf] }
  0x39   : >> { %393 = vst [vmem:[%s2422_s22 + $0xb4] sm:$0xf] %v392_v45  ;;  %395 = vst [vmem:[%s2422_s22 + $0xb8] sm:$0xf] %v394_v46  ;;  %v398_v48 = vld [vmem:[%s2420_s21 + $0xd8] sm:$0xf] }
  0x3a   : >> { %397 = vst [vmem:[%s2422_s22 + $0xbc] sm:$0xf] %v396_v47  ;;  %v400_v49 = vld [vmem:[%s2420_s21 + $0xdc] sm:$0xf]  ;;  %v402_v50 = vld [vmem:[%s2420_s21 + $0xe0] sm:$0xf] }
  0x3b   : >> { %399 = vst [vmem:[%s2422_s22 + $0xc0] sm:$0xf] %v398_v48  ;;  %401 = vst [vmem:[%s2422_s22 + $0xc4] sm:$0xf] %v400_v49  ;;  %v404_v51 = vld [vmem:[%s2420_s21 + $0xe4] sm:$0xf] }
  0x3c   : >> { %403 = vst [vmem:[%s2422_s22 + $0xc8] sm:$0xf] %v402_v50  ;;  %v406_v52 = vld [vmem:[%s2420_s21 + $0xe8] sm:$0xf]  ;;  %v408_v53 = vld [vmem:[%s2420_s21 + $0xec] sm:$0xf] }
  0x3d   : >> { %405 = vst [vmem:[%s2422_s22 + $0xcc] sm:$0xf] %v404_v51  ;;  %407 = vst [vmem:[%s2422_s22 + $0xd0] sm:$0xf] %v406_v52  ;;  %v410_v54 = vld [vmem:[%s2420_s21 + $0xf0] sm:$0xf] }
  0x3e   : >> { %409 = vst [vmem:[%s2422_s22 + $0xd4] sm:$0xf] %v408_v53  ;;  %v412_v55 = vld [vmem:[%s2420_s21 + $0xf4] sm:$0xf]  ;;  %v414_v56 = vld [vmem:[%s2420_s21 + $0xf8] sm:$0xf] }
  0x3f   : >> { %411 = vst [vmem:[%s2422_s22 + $0xd8] sm:$0xf] %v410_v54  ;;  %413 = vst [vmem:[%s2422_s22 + $0xdc] sm:$0xf] %v412_v55  ;;  %v416_v57 = vld [vmem:[%s2420_s21 + $0xfc] sm:$0xf] }
  0x40   : >> { %415 = vst [vmem:[%s2422_s22 + $0xe0] sm:$0xf] %v414_v56  ;;  %v418_v58 = vld [vmem:[%s2420_s21 + $0x100] sm:$0xf]  ;;  %v420_v59 = vld [vmem:[%s2420_s21 + $0x104] sm:$0xf] }
  0x41   : >> { %417 = vst [vmem:[%s2422_s22 + $0xe4] sm:$0xf] %v416_v57  ;;  %419 = vst [vmem:[%s2422_s22 + $0xe8] sm:$0xf] %v418_v58  ;;  %v422_v60 = vld [vmem:[%s2420_s21 + $0x108] sm:$0xf] }
  0x42   : >> { %421 = vst [vmem:[%s2422_s22 + $0xec] sm:$0xf] %v420_v59  ;;  %v424_v61 = vld [vmem:[%s2420_s21 + $0x10c] sm:$0xf]  ;;  %v426_v62 = vld [vmem:[%s2420_s21 + $0x110] sm:$0xf] }
  0x43   : >> { %423 = vst [vmem:[%s2422_s22 + $0xf0] sm:$0xf] %v422_v60  ;;  %425 = vst [vmem:[%s2422_s22 + $0xf4] sm:$0xf] %v424_v61  ;;  %v428_v63 = vld [vmem:[%s2420_s21 + $0x114] sm:$0xf] }
  0x44   : >> { %427 = vst [vmem:[%s2422_s22 + $0xf8] sm:$0xf] %v426_v62  ;;  %429 = vst [vmem:[%s2422_s22 + $0xfc] sm:$0xf] %v428_v63  ;;  %p295_p11 = scmp.ge.s32.totalorder %s296_s23, 1 }
  0x46   : > { %298 = sbr.rel (!%p295_p11) target bundleno = 26 (0x1a), region = 226 }
  0x4b PF: > { %691 = sbr.rel (!%p2391_p4) target bundleno = 82 (0x52), region = 98  ;;  %s693_s30 = sand.u32 (%p2391_p4), 1, %s2283_s26  }
  0x4c   : > { %s1823_s8 = smul.u32 (%p2391_p4), 288, %s2291_s28  ;;  %s1822_s10 = sshll.u32 (%p2391_p4), %s693_s30, 5 }
  0x4d   : > { %s695_s18 = scalar_lea.vmem (%p2391_p4), [#allocation3], %s1822_s10 }
  0x4e   : > { %s1694_s17 = scalar_lea.vmem (%p2391_p4), %s3016_s1, %s1823_s8 }
  0x4f   : > { %v1824_v0 = vld [vmem:[%s1694_s17 + $0x40] sm:$0xff] (%p2391_p4)   ;;  %v1826_v1 = vld [vmem:[%s1694_s17 + $0x88] sm:$0xff] (%p2391_p4)   ;;  %v1828_v2 = vld [vmem:[%s1694_s17 + $0xd0] sm:$0xff] (%p2391_p4)  }
  0x50   : > { %720 = vst [vmem:[%s695_s18] sm:$0xff] %v1824_v0   ;;  %724 = vst [vmem:[%s695_s18 + $0x8] sm:$0xff] %v1826_v1   ;;  %v1830_v3 = vld [vmem:[%s1694_s17 + $0x118] sm:$0xff]  }
  0x51   : > { %728 = vst [vmem:[%s695_s18 + $0x10] sm:$0xff] %v1828_v2   ;;  %732 = vst [vmem:[%s695_s18 + $0x18] sm:$0xff] %v1830_v3  }
  0x52 PF: > { %p1832_p12 = scmp.ge.s32.totalorder %s2295_s29, 1  ;;  %p773_p13 = scmp.lt.s32.totalorder %s2295_s29, 3 }
  0x54   : > { %p774_p0 = pnand %p1832_p12, %p773_p13 }
  0x55   : > { %s2570_s11 = sand.u32 (!%p774_p0), 1, %s2279_s25   ;;  %s2301_s21 = smov (!%p774_p0), 24  }
  0x56   : > { %777 = sbr.rel (%p774_p0) target bundleno = 701 (0x2bd), region = 139  ;;  %s1833_s19 = sshll.u32 (!%p774_p0), %s2570_s11, 8 }
  0x57   : > { %s2573_s20 = scalar_lea.vmem (!%p774_p0), [#allocation2], %s1833_s19  ;;  %s2302_s22 = smov (!%p774_p0), 8  }
  0x58   : > { %s2303_s23 = smov (!%p774_p0), 16   ;;  %s2304_s30 = smov (!%p774_p0), 32  }
  0x59   : > { %s2305_s8 = smov (!%p774_p0), 40   ;;  %s2306_s10 = smov (!%p774_p0), 48  }
  0x5a   : > { %s3023_s13 = smov (!%p774_p0), 56   ;;  %s3026_s18 = smov (!%p774_p0), 64  }
  0x5b   : > { %v2576_v4 = vld [vmem:[%s2573_s20 + $0x90] ss:$8 sps:$4 sm:$0xff]   ;;  %v2579_v5 = vld [vmem:[%s2573_s20 + $0x40] ss:$8 sps:$4 sm:$0xff]   ;;  %v839_v12 = vld [vmem:[%s2573_s20 + $0x4] sm:$0x1] }
  0x5c   : > { %v2582_v6 = vld [vmem:[%s2573_s20 + $0x50] ss:$8 sps:$4 sm:$0xff]   ;;  %v920_v7 = vunpack.c.l.bf16 %v2576_v4  ;;  %v922_v8 = vunpack.c.h.bf16 %v2576_v4  ;;  %v907_v9 = vunpack.c.l.bf16 %v2579_v5  ;;  %v908_v10 = vunpack.c.h.bf16 %v2579_v5  ;;  %v2589_v11 = vld [vmem:[%s2573_s20] ss:$8 sps:$4 sm:$0xff]   ;;  %v841_v13 = vld [vmem:[%s2573_s20 + $0xc] sm:$0x1] }
  0x5d   : > { %v909_v14 = vunpack.c.l.bf16 %v2582_v6  ;;  %v910_v15 = vunpack.c.h.bf16 %v2582_v6  ;;  %v889_v16 = vunpack.c.l.bf16 %v2589_v11  ;;  %v890_v17 = vunpack.c.l.bf16 %v839_v12  ;;  %v862_v18 = vld [vmem:[%s2573_s20 + $0x80] ss:$8 sps:$4 sm:$0xff]   ;;  %v842_v19 = vld [vmem:[%s2573_s20 + $0x10] ss:$8 sps:$4 sm:$0xff]   ;;  %v843_v22 = vld [vmem:[%s2573_s20 + $0x14] sm:$0x1] }
  0x5e   : > { %v2023_v20 = vpack.i.bf16 %v922_v8, %v920_v7  ;;  %v2008_v21 = vpack.i.bf16 %v908_v10, %v907_v9  ;;  %vm988_vm0 = vcmask 1046528   ;;  %v2606_v24 = vunpack.c.h.bf16 %v2589_v11  ;;  %v845_v30 = vld [vmem:[%s2573_s20 + $0x1c] sm:$0x1]  ;;  %v878_v36 = vld [vmem:[%s2573_s20 + $0xc0] ss:$8 sps:$4 sm:$0xff]  }
  0x5f   : > { %v2013_v23 = vpack.i.bf16 %v910_v15, %v909_v14  ;;  %v892_v25 = vunpack.c.l.bf16 %v841_v13  ;;  %v989_v26 = vrot.slane %v889_v16, 1  ;;  %v990_v27 = vrot.slane %v890_v17, 1  ;;  %v880_v41 = vld [vmem:[%s2573_s20 + $0xd0] ss:$8 sps:$4 sm:$0xff]   ;;  %v863_v42 = vld [vmem:[%s2573_s20 + $0x84] sm:$0x1] }
  0x60   : > { %2024 = vrot.lane.b32.xlu1 %v2023_v20, %s2301_s21  ;;  %2009 = vrot.lane.b32.xlu0 %v2008_v21, %s2302_s22  ;;  %v916_v28 = vunpack.c.l.bf16 %v862_v18  ;;  %v918_v29 = vunpack.c.h.bf16 %v862_v18  ;;  %v2613_v31 = vunpack.c.l.bf16 %v842_v19  ;;  %v992_v32 = vrot.slane %v2606_v24, 1  ;;  %v865_v47 = vld [vmem:[%s2573_s20 + $0x8c] sm:$0x1]  ;;  %v867_v48 = vld [vmem:[%s2573_s20 + $0x94] sm:$0x1] }
  0x61   : > { %v993_v33 = vrot.slane %v892_v25, 1  ;;  %v894_v34 = vunpack.c.l.bf16 %v843_v22  ;;  %v2616_v35 = vunpack.c.h.bf16 %v842_v19  ;;  %v1118_v37 = vrot.slane %v922_v8, 1  ;;  %v869_v53 = vld [vmem:[%s2573_s20 + $0x9c] sm:$0x1]  ;;  %v2648_v19 = vld [vmem:[%s2573_s20 + $0x20] ss:$72 sps:$4 sm:$0xff]  }
  0x62   : > { %v991_v38 = vsel %vm988_vm0, %v989_v26, %v990_v27  ;;  %v1112_v39 = vrot.slane %v918_v29, 1  ;;  %v2018_v40 = vpack.i.bf16 %v918_v29, %v916_v28  ;;  %v896_v44 = vunpack.c.l.bf16 %v845_v30  ;;  %v2657_v25 = vld [vmem:[%s2573_s20 + $0x60] ss:$16 sps:$4 sm:$0xff]   ;;  %v2667_v30 = vld [vmem:[%s2573_s20 + $0x28] ss:$80 sps:$4 sm:$0xff]  }
  0x63   : > { %v2623_v43 = vsel %vm988_vm0, %v992_v32, %v993_v33  ;;  %v995_v45 = vrot.slane %v2613_v31, 1  ;;  %v996_v46 = vrot.slane %v894_v34, 1  ;;  %v998_v50 = vrot.slane %v2616_v35, 1  ;;  %v849_v32 = vld [vmem:[%s2573_s20 + $0x2c] sm:$0x1] }
  0x64   : > { %2014 = vrot.lane.b32.xlu0 %v2013_v23, %s2302_s22  ;;  %v2033_v49 = vpack.i.bf16 %v2623_v43, %v991_v38  ;;  %v932_v51 = vunpack.c.l.bf16 %v878_v36  ;;  %v933_v52 = vunpack.c.h.bf16 %v878_v36  ;;  %v1109_v54 = vrot.slane %v916_v28, 1  ;;  %v847_v23 = vld [vmem:[%s2573_s20 + $0x24] sm:$0x1]  ;;  %v850_v34 = vld [vmem:[%s2573_s20 + $0x30] ss:$8 sps:$4 sm:$0xff]  }
  0x65   : > { %v2633_v55 = vsel %vm988_vm0, %v995_v45, %v996_v46  ;;  %v999_v56 = vrot.slane %v896_v44, 1  ;;  %v934_v57 = vunpack.c.l.bf16 %v880_v41  ;;  %v935_v58 = vunpack.c.h.bf16 %v880_v41  ;;  %v851_v36 = vld [vmem:[%s2573_s20 + $0x34] sm:$0x1] }
  0x66   : > { %2034 = vrot.lane.b32.xlu1 %v2033_v49, %s2303_s23  ;;  %v917_v59 = vunpack.c.l.bf16 %v863_v42  ;;  %v919_v60 = vunpack.c.l.bf16 %v865_v47  ;;  %v921_v61 = vunpack.c.l.bf16 %v867_v48  ;;  %v1115_v62 = vrot.slane %v920_v7, 1 }
  0x67   : > { %v2637_v63 = vsel %vm988_vm0, %v998_v50, %v999_v56  ;;  %v2028_v0 = vpack.i.bf16 %v933_v52, %v932_v51  ;;  %v923_v1 = vunpack.c.l.bf16 %v869_v53  ;;  %v2043_v7 = vpack.i.bf16 %v935_v58, %v934_v57  ;;  %v2169_v56 = vld [vmem:[%s3017_s2 + $0x18] sm:$0xff]   ;;  %v870_v58 = vld [vmem:[%s2573_s20 + $0xa0] ss:$8 sps:$4 sm:$0xff]  }
  0x68   : > { %2019 = vrot.lane.b32.xlu0 %v2018_v40, %s2301_s21  ;;  %v2038_v2 = vpack.i.bf16 %v2637_v63, %v2633_v55  ;;  %v1110_v3 = vrot.slane %v917_v59, 1  ;;  %v1113_v4 = vrot.slane %v919_v60, 1  ;;  %v1116_v8 = vrot.slane %v921_v61, 1  ;;  %v871_v60 = vld [vmem:[%s2573_s20 + $0xa4] sm:$0x1] }
  0x69   : > { %v1119_v9 = vrot.slane %v923_v1, 1  ;;  %v2653_v22 = vunpack.c.l.bf16 %v2648_v19  ;;  %v2058_v26 = vpack.i.bf16 %v2613_v31, %v2606_v24  ;;  %v898_v27 = vunpack.c.l.bf16 %v847_v23  ;;  %v873_v61 = vld [vmem:[%s2573_s20 + $0xac] sm:$0x1]  ;;  %v874_v1 = vld [vmem:[%s2573_s20 + $0xb0] ss:$8 sps:$4 sm:$0xff]  }
  0x6a   : > { %2039 = vrot.lane.b32.xlu1 %v2038_v2, %s2303_s23  ;;  %v1111_v12 = vsel %vm988_vm0, %v1109_v54, %v1110_v3  ;;  %v1114_v13 = vsel %vm988_vm0, %v1112_v39, %v1113_v4  ;;  %v1117_v17 = vsel %vm988_vm0, %v1115_v62, %v1116_v8  ;;  %v911_v29 = vunpack.c.l.bf16 %v2657_v25  ;;  %v875_v8 = vld [vmem:[%s2573_s20 + $0xb4] sm:$0x1]  ;;  %v884_v23 = vld [vmem:[%s2573_s20 + $0xf0] ss:$8 sps:$4 sm:$0xff]  }
  0x6b   : > { %v1120_v18 = vsel %vm988_vm0, %v1118_v37, %v1119_v9  ;;  %v2048_v20 = vpack.i.bf16 %v1114_v13, %v1111_v12  ;;  %v2063_v28 = vpack.i.bf16 %v2653_v22, %v2616_v35  ;;  %v2068_v33 = vpack.i.bf16 %v909_v14, %v908_v10  ;;  %v853_v37 = vld [vmem:[%s2573_s20 + $0x3c] sm:$0x1]  ;;  %v882_v12 = vld [vmem:[%s2573_s20 + $0xe0] ss:$8 sps:$4 sm:$0xff]  }
  0x6c   : > { %2029 = vrot.lane.b32.xlu0 %v2028_v0, %s2304_s30  ;;  %v2053_v21 = vpack.i.bf16 %v1120_v18, %v1117_v17  ;;  %v1001_v38 = vrot.slane %v2653_v22, 1  ;;  %v1002_v39 = vrot.slane %v898_v27, 1  ;;  %v2680_v40 = vunpack.c.l.bf16 %v2667_v30  ;;  %v877_v9 = vld [vmem:[%s2573_s20 + $0xbc] sm:$0x1]  ;;  %s3025_s20 = sshll.u32 %s2287_s27, 9 }
  0x6d   : > { %v900_v41 = vunpack.c.l.bf16 %v849_v32  ;;  %v2073_v42 = vpack.i.bf16 %v911_v29, %v910_v15  ;;  %v912_v5 = vunpack.c.h.bf16 %v2648_v19  ;;  %v2686_v44 = vunpack.c.l.bf16 %v850_v34 }
  0x6e   : > { %2044 = vrot.lane.b32.xlu1 %v2043_v7, %s2304_s30  ;;  %v902_v10 = vunpack.c.l.bf16 %v851_v36  ;;  %v2688_v14 = vunpack.c.h.bf16 %v850_v34  ;;  %v904_v45 = vunpack.c.l.bf16 %v853_v37  ;;  %v2078_v46 = vpack.i.bf16 %v2633_v55, %v2623_v43  ;;  %v2168_v43 = vld [vmem:[%s3017_s2 + $0x20] ss:$0 sps:$4 sm:$0xff]   ;;  %v2170_v7 = vld [vmem:[%s3017_s2 + $0x10] sm:$0xff]  }
  0x6f   : > { %v1003_v47 = vsel %vm988_vm0, %v1001_v38, %v1002_v39  ;;  %v1004_v48 = vrot.slane %v2680_v40, 1  ;;  %v1005_v6 = vrot.slane %v900_v41, 1  ;;  %v2083_v15 = vpack.i.bf16 %v912_v5, %v911_v29 }
  0x70   : > { %2049 = vrot.lane.b32.xlu0 %v2048_v20, %s2305_s8  ;;  %v913_v49 = vunpack.c.h.bf16 %v2657_v25  ;;  %v914_v50 = vunpack.c.h.bf16 %v2667_v30  ;;  %v1007_v51 = vrot.slane %v2686_v44, 1  ;;  %v1008_v52 = vrot.slane %v902_v10, 1 }
  0x71   : > { %v1010_v53 = vrot.slane %v2688_v14, 1  ;;  %v1011_v54 = vrot.slane %v904_v45, 1  ;;  %v2088_v55 = vpack.i.bf16 %v1003_v47, %v2637_v63  ;;  %v2711_v57 = vsel %vm988_vm0, %v1004_v48, %v1005_v6  ;;  %v2172_v6 = vld [vmem:[%s3017_s2] sm:$0xff]  }
  0x72   : > { %2054 = vrot.lane.b32.xlu1 %v2053_v21, %s2305_s8  ;;  %vm1367_vm1 = vcmask 1043456   ;;  %v2093_v59 = vpack.i.bf16 %v914_v50, %v913_v49  ;;  %v2724_v63 = vsel %vm988_vm0, %v1007_v51, %v1008_v52  ;;  %v2098_v2 = vpack.i.bf16 %v2711_v57, %v1003_v47 }
  0x73   : > { %1904 = vmatprep.subr.msk.bf16.mxu0 %vm1367_vm1, %v2168_v43  ;;  %v1369_v62 = vsel %vm1367_vm1, %v2168_v43, 0  ;;  %v2727_v0 = vsel %vm988_vm0, %v1010_v53, %v1011_v54  ;;  %v924_v3 = vunpack.c.l.bf16 %v870_v58  ;;  %v926_v4 = vunpack.c.h.bf16 %v870_v58 }
  0x74   : > { %2059 = vrot.lane.b32.xlu0 %v2058_v26, %s2306_s10  ;;  %1877 = vmatpush3.bf16.msra.mxu0 %v1369_v62  ;;  %v925_v13 = vunpack.c.l.bf16 %v871_v60  ;;  %v927_v17 = vunpack.c.l.bf16 %v873_v61  ;;  %v2103_v18 = vpack.i.bf16 %v2727_v0, %v2724_v63  ;;  %v928_v20 = vunpack.c.l.bf16 %v874_v1 }
  0x75   : > { %1878 = vmatprep.subr.bf16.mxu0 %v2169_v56  ;;  %v930_v21 = vunpack.c.h.bf16 %v874_v1  ;;  %v929_v26 = vunpack.c.l.bf16 %v875_v8  ;;  %v931_v27 = vunpack.c.l.bf16 %v877_v9  ;;  %v936_v29 = vunpack.c.l.bf16 %v882_v12 }
  0x76   : > { %2064 = vrot.lane.b32.xlu1 %v2063_v28, %s2306_s10  ;;  %v2108_v28 = vpack.i.bf16 %v926_v4, %v924_v3  ;;  %v937_v32 = vunpack.c.h.bf16 %v882_v12  ;;  %v1124_v34 = vrot.slane %v926_v4, 1  ;;  %v1121_v36 = vrot.slane %v924_v3, 1 }
  0x77   : > { %v1122_v37 = vrot.slane %v925_v13, 1  ;;  %v1125_v38 = vrot.slane %v927_v17, 1  ;;  %v2113_v39 = vpack.i.bf16 %v930_v21, %v928_v20  ;;  %v938_v41 = vunpack.c.l.bf16 %v884_v23 }
  0x78   : > { %2069 = vrot.lane.b32.xlu0 %v2068_v33, %s3023_s13  ;;  %1879 = vmatpush3.bf16.msra.mxu0 %v2169_v56  ;;  %v2171_v33 = vld [vmem:[%s3017_s2 + $0x8] sm:$0xff]   ;;  %v1130_v10 = vrot.slane %v930_v21, 1  ;;  %v1127_v45 = vrot.slane %v928_v20, 1  ;;  %v1131_v47 = vrot.slane %v931_v27, 1  ;;  %v2118_v48 = vpack.i.bf16 %v937_v32, %v936_v29 }
  0x79   : > { %1880 = vmatprep.subr.bf16.mxu0 %v2170_v7  ;;  %v1126_v43 = vsel %vm988_vm0, %v1124_v34, %v1125_v38  ;;  %v2138_v61 = vpack.i.bf16 %v2686_v44, %v2680_v40  ;;  %v2148_v4 = vpack.i.bf16 %v913_v49, %v912_v5  ;;  %vm1235_vm2 = vcmask 64512  }
  0x7a   : > { %2074 = vrot.lane.b32.xlu1 %v2073_v42, %s3023_s13  ;;  %v939_v42 = vunpack.c.h.bf16 %v884_v23  ;;  %v1132_v53 = vsel %vm988_vm0, %v1130_v10, %v1131_v47  ;;  %vm1244_vm3 = vcmask 130048   ;;  %vm1253_vm4 = vcmask 195584  }
  0x7b   : > { %vm1262_vm5 = vcmask 261120   ;;  %vm1271_vm6 = vcmask 326656   ;;  %vm1280_vm7 = vcmask 392192   ;;  %vm1289_vm8 = vcmask 457728  }
  0x7c   : > { %2079 = vrot.lane.b32.xlu0 %v2078_v46, %s3026_s18  ;;  %v1128_v46 = vrot.slane %v929_v26, 1  ;;  %1881 = vmatpush3.bf16.msra.mxu0 %v2170_v7  ;;  %v2123_v51 = vpack.i.bf16 %v939_v42, %v938_v41  ;;  %v2158_v7 = vpack.i.bf16 %v2724_v63, %v2711_v57  ;;  %vm1298_vm9 = vcmask 523264  }
  0x7d   : > { %1882 = vmatprep.subr.bf16.mxu0 %v2171_v33  ;;  %vm1354_vm10 = vcmask 588800   ;;  %vm1452_vm11 = vcmask 60416  }
  0x7e   : > { %2084 = vrot.lane.b32.xlu1 %v2083_v15, %s2302_s22  ;;  %v1123_v15 = vsel %vm988_vm0, %v1121_v36, %v1122_v37  ;;  %v1129_v52 = vsel %vm988_vm0, %v1127_v45, %v1128_v46 }
  0x7f   : > { %v2133_v58 = vpack.i.bf16 %v1132_v53, %v1129_v52 }
  0x80   : > { %2089 = vrot.lane.b32.xlu0 %v2088_v55, %s3026_s18  ;;  %1883 = vmatpush3.bf16.msra.mxu0 %v2171_v33  ;;  %v2128_v55 = vpack.i.bf16 %v1126_v43, %v1123_v15 }
  0x81   : > { %1884 = vmatprep.subr.bf16.mxu0 %v2172_v6 }
  0x82   : > { %2094 = vrot.lane.b32.xlu1 %v2093_v59, %s2302_s22  ;;  %s2747_s22 = sshll.u32 %s2570_s11, 5 }
  0x83   : > { %s2877_s17 = scalar_lea.vmem [#allocation4], %s2747_s22 }
  0x84   : > { %2099 = vrot.lane.b32.xlu0 %v2098_v2, %s2303_s23  ;;  %1885 = vmatpush3.bf16.msra.mxu0 %v2172_v6  ;;  %s1591_s19 = sshll.u32 %s2877_s17, 4  ;;  %s2900_s19 = int_to_ptr.vmem [resolvable:$true] %s1591_s19 }
  0x86   : > { %2104 = vrot.lane.b32.xlu1 %v2103_v18, %s2303_s23  ;;  %s789_s23 = scalar_lea.vmem [#allocation3], %s2747_s22 }
  0x87   : > { %v886_v54 = vld [vmem:[%s789_s23] ss:$8 sps:$4 sm:$0xff]   ;;  %v887_v56 = vld [vmem:[%s789_s23 + $0x4] sm:$0x1] }
  0x88   : > { %2109 = vrot.lane.b32.xlu0 %v2108_v28, %s2301_s21  ;;  %v905_v59 = vunpack.c.l.bf16 %v886_v54  ;;  %v906_v60 = vunpack.c.l.bf16 %v887_v56  ;;  %v915_v1 = vunpack.c.h.bf16 %v886_v54 }
  0x8a   : > { %2114 = vrot.lane.b32.xlu1 %v2113_v39, %s2301_s21  ;;  %v2143_v62 = vpack.i.bf16 %v905_v59, %v2688_v14  ;;  %v1208_v2 = vrot.slane %v905_v59, 1  ;;  %v1209_v3 = vrot.slane %v906_v60, 1  ;;  %v2153_v8 = vpack.i.bf16 %v915_v1, %v914_v50  ;;  %s3032_s21 = smov 56  }
  0x8c   : > { %2119 = vrot.lane.b32.xlu0 %v2118_v48, %s2304_s30  ;;  %v1210_v9 = vsel %vm988_vm0, %v1208_v2, %v1209_v3 }
  0x8d   : > { %v2163_v12 = vpack.i.bf16 %v1210_v9, %v2727_v0 }
  0x8e   : > { %2124 = vrot.lane.b32.xlu1 %v2123_v51, %s2304_s30 }
  0x90   : > { %2129 = vrot.lane.b32.xlu0 %v2128_v55, %s2305_s8 }
  0x92   : > { %2134 = vrot.lane.b32.xlu1 %v2133_v58, %s2305_s8  ;;  %s2173_s8 = scalar_lea.vmem %s2900_s19, 512 }
  0x93   : > { %p2174_p1 = scmp.ne.s32.totalorder %s2900_s19, %s2173_s8 }
  0x94   : > { %2139 = vrot.lane.b32.xlu0 %v2138_v61, %s2306_s10 }
  0x95   : > { %p2175_p2 = pnand %p2174_p1, %p2395_p5 }
  0x96   : > { %2144 = vrot.lane.b32.xlu1 %v2143_v62, %s2306_s10  ;;  %s2309_s10 = smov [#allocation4]  }
  0x97   : > { %p2176_p3 = pneg %p2175_p2  ;;  %s2177_s16 = sshll.u32 %s2309_s10, 4  ;;  %s2178_s16 = int_to_ptr.vmem [resolvable:$false] %s2177_s16 }
  0x98   : > { %2149 = vrot.lane.b32.xlu0 %v2148_v4, %s3032_s21  ;;  %p2180_p4 = scmp.lt.s32.totalorder %s2900_s19, %s2178_s16 }
  0x9a   : > { %2154 = vrot.lane.b32.xlu1 %v2153_v8, %s3032_s21  ;;  %s2908_s21 = scalar_lea.hbm %s3021_s6, %s3025_s20 }
  0x9c   : > { %2159 = vrot.lane.b32.xlu0 %v2158_v7, %s3026_s18 }
  0x9e   : > { %2164 = vrot.lane.b32.xlu1 %v2163_v12, %s3026_s18 }
  0xd2   : > { %v2025_v19 = vpop.permute.xlu1 %2024  ;;  %v2010_v25 = vpop.permute.xlu0 %2009 }
  0xd3   : > { %v2012_v23 = vunpack.i.h.bf16 %v2010_v25  ;;  %v2011_v26 = vunpack.i.l.bf16 %v2010_v25  ;;  %v2027_v27 = vunpack.i.h.bf16 %v2025_v19  ;;  %v2026_v28 = vunpack.i.l.bf16 %v2025_v19 }
  0xd5   : > { %v1236_v46 = vsel %vm1235_vm2, %v889_v16, %v2011_v26  ;;  %v1237_v47 = vsel %vm1235_vm2, %v2606_v24, %v2012_v23 }
  0xd6   : > { %v2015_v5 = vpop.permute.xlu0 %2014 }
  0xd7   : > { %v2017_v57 = vunpack.i.h.bf16 %v2015_v5  ;;  %v2016_v63 = vunpack.i.l.bf16 %v2015_v5 }
  0xd8   : > { %v2035_v30 = vpop.permute.xlu1 %2034 }
  0xd9   : > { %v2037_v29 = vunpack.i.h.bf16 %v2035_v30  ;;  %v2036_v32 = vunpack.i.l.bf16 %v2035_v30  ;;  %v1238_v34 = vsel %vm1235_vm2, %v2613_v31, %v2016_v63  ;;  %v1239_v36 = vsel %vm1235_vm2, %v2616_v35, %v2017_v57 }
  0xda   : > { %v2020_v49 = vpop.permute.xlu0 %2019 }
  0xdb   : > { %v2022_v37 = vunpack.i.h.bf16 %v2020_v49  ;;  %v2021_v38 = vunpack.i.l.bf16 %v2020_v49  ;;  %v1246_v35 = vsel %vm1244_vm3, %v1237_v47, %v2037_v29  ;;  %v1245_v6 = vsel %vm1244_vm3, %v1236_v46, %v2036_v32 }
  0xdc   : > { %v2040_v50 = vpop.permute.xlu1 %2039 }
  0xdd   : > { %v2042_v0 = vunpack.i.h.bf16 %v2040_v50  ;;  %v2041_v20 = vunpack.i.l.bf16 %v2040_v50  ;;  %v1254_v52 = vsel %vm1253_vm4, %v1245_v6, %v2021_v38  ;;  %v1255_v53 = vsel %vm1253_vm4, %v1246_v35, %v2022_v37 }
  0xde   : > { %v2030_v13 = vpop.permute.xlu0 %2029 }
  0xdf   : > { %v1248_v39 = vsel %vm1244_vm3, %v1239_v36, %v2042_v0  ;;  %v1247_v41 = vsel %vm1244_vm3, %v1238_v34, %v2041_v20  ;;  %v2032_v42 = vunpack.i.h.bf16 %v2030_v13  ;;  %v2031_v10 = vunpack.i.l.bf16 %v2030_v13 }
  0xe0   : > { %v2783_v17 = vpop.permute.xlu1 %2044  ;;  %v1256_v11 = vsel %vm1253_vm4, %v1247_v41, %v2026_v28  ;;  %v1257_v16 = vsel %vm1253_vm4, %v1248_v39, %v2027_v27 }
  0xe1   : > { %v1263_v24 = vsel %vm1262_vm5, %v1254_v52, %v2031_v10  ;;  %v1264_v54 = vsel %vm1262_vm5, %v1255_v53, %v2032_v42  ;;  %v2047_v59 = vunpack.i.h.bf16 %v2783_v17  ;;  %v2046_v60 = vunpack.i.l.bf16 %v2783_v17 }
  0xe2   : > { %v2050_v18 = vpop.permute.xlu0 %2049 }
  0xe3   : > { %v2052_v31 = vunpack.i.h.bf16 %v2050_v18  ;;  %v2051_v48 = vunpack.i.l.bf16 %v2050_v18  ;;  %v1265_v13 = vsel %vm1262_vm5, %v1256_v11, %v2046_v60  ;;  %v1266_v17 = vsel %vm1262_vm5, %v1257_v16, %v2047_v59 }
  0xe4   : > { %v2785_v21 = vpop.permute.xlu1 %2054 }
  0xe5   : > { %v1272_v61 = vsel %vm1271_vm6, %v1263_v24, %v2051_v48  ;;  %v1273_v62 = vsel %vm1271_vm6, %v1264_v54, %v2052_v31  ;;  %v2057_v1 = vunpack.i.h.bf16 %v2785_v21  ;;  %v2056_v2 = vunpack.i.l.bf16 %v2785_v21 }
  0xe6   : > { %v2060_v33 = vpop.permute.xlu0 %2059 }
  0xe7   : > { %v2062_v15 = vunpack.i.h.bf16 %v2060_v33  ;;  %v2061_v43 = vunpack.i.l.bf16 %v2060_v33  ;;  %v1274_v63 = vsel %vm1271_vm6, %v1265_v13, %v2056_v2  ;;  %v1275_v0 = vsel %vm1271_vm6, %v1266_v17, %v2057_v1 }
  0xe8   : > { %v2065_v45 = vpop.permute.xlu1 %2064 }
  0xe9   : > { %v1281_v3 = vsel %vm1280_vm7, %v1272_v61, %v2061_v43  ;;  %v1282_v4 = vsel %vm1280_vm7, %v1273_v62, %v2062_v15  ;;  %v2067_v9 = vunpack.i.h.bf16 %v2065_v45  ;;  %v2066_v7 = vunpack.i.l.bf16 %v2065_v45 }
  0xea   : > { %v2070_v51 = vpop.permute.xlu0 %2069 }
  0xeb   : > { %v2072_v55 = vunpack.i.h.bf16 %v2070_v51  ;;  %v2071_v56 = vunpack.i.l.bf16 %v2070_v51  ;;  %v1283_v23 = vsel %vm1280_vm7, %v1274_v63, %v2066_v7  ;;  %v1284_v26 = vsel %vm1280_vm7, %v1275_v0, %v2067_v9 }
  0xec   : > { %v2075_v58 = vpop.permute.xlu1 %2074 }
  0xed   : > { %v2077_v25 = vunpack.i.h.bf16 %v2075_v58  ;;  %v2076_v5 = vunpack.i.l.bf16 %v2075_v58  ;;  %v1290_v49 = vsel %vm1289_vm8, %v1281_v3, %v2071_v56  ;;  %v1291_v50 = vsel %vm1289_vm8, %v1282_v4, %v2072_v55 }
  0xee   : > { %v2080_v8 = vpop.permute.xlu0 %2079 }
  0xef   : > { %v2082_v12 = vunpack.i.h.bf16 %v2080_v8  ;;  %v2081_v19 = vunpack.i.l.bf16 %v2080_v8  ;;  %v1292_v29 = vsel %vm1289_vm8, %v1283_v23, %v2076_v5  ;;  %v1293_v32 = vsel %vm1289_vm8, %v1284_v26, %v2077_v25 }
  0xf0   : > { %v2085_v30 = vpop.permute.xlu1 %2084 }
  0xf1   : > { %v1299_v18 = vsel %vm1298_vm9, %v1290_v49, %v2081_v19  ;;  %v1300_v57 = vsel %vm1298_vm9, %v1291_v50, %v2082_v12  ;;  %v2087_v46 = vunpack.i.h.bf16 %v2085_v30  ;;  %v2086_v47 = vunpack.i.l.bf16 %v2085_v30 }
  0xf2   : > { %v2090_v20 = vpop.permute.xlu0 %2089  ;;  %v1307_v21 = vpack.c.bf16 %v1300_v57, %v1299_v18 }
  0xf3   : > { %v2092_v27 = vunpack.i.h.bf16 %v2090_v20  ;;  %v2091_v28 = vunpack.i.l.bf16 %v2090_v20  ;;  %v1241_v16 = vsel %vm1235_vm2, %v2680_v40, %v2087_v46  ;;  %v1240_v24 = vsel %vm1235_vm2, %v2653_v22, %v2086_v47 }
  0xf4   : > { %v2095_v33 = vpop.permute.xlu1 %2094  ;;  %1886 = vmatprep.mubr.msk.bf16.mxu0 %vm1354_vm10, %v1307_v21 }
  0xf5   : > { %v1301_v34 = vsel %vm1298_vm9, %v1292_v29, %v2091_v28  ;;  %v1302_v36 = vsel %vm1298_vm9, %v1293_v32, %v2092_v27  ;;  %v2097_v31 = vunpack.i.h.bf16 %v2095_v33  ;;  %v2096_v48 = vunpack.i.l.bf16 %v2095_v33 }
  0xf6   : > { %v1308_v37 = vpack.c.bf16 %v1302_v36, %v1301_v34  ;;  %v2100_v38 = vpop.permute.xlu0 %2099 }
  0xf7   : > { %v2102_v6 = vunpack.i.h.bf16 %v2100_v38  ;;  %v2101_v15 = vunpack.i.l.bf16 %v2100_v38  ;;  %v1243_v54 = vsel %vm1235_vm2, %v2688_v14, %v2097_v31  ;;  %v1242_v55 = vsel %vm1235_vm2, %v2686_v44, %v2096_v48 }
  0xf8   : > { %v2105_v39 = vpop.permute.xlu1 %2104  ;;  %1887 = vmatmul.mubr.msk.bf16.vlgmr.msra.gmra.mxu0 %vm1354_vm10, %v1308_v37 }
  0xf9   : > { %v2107_v43 = vunpack.i.h.bf16 %v2105_v39  ;;  %v2106_v51 = vunpack.i.l.bf16 %v2105_v39  ;;  %v1249_v60 = vsel %vm1244_vm3, %v1240_v24, %v2101_v15  ;;  %v1250_v61 = vsel %vm1244_vm3, %v1241_v16, %v2102_v6  ;;  %v1837_v16 = vld [vmem:[%s3018_s3] ss:$0 sm:$0xff] }
  0xfa   : > { %v2110_v41 = vpop.permute.xlu0 %2109 }
  0xfb   : > { %v2112_v52 = vunpack.i.h.bf16 %v2110_v41  ;;  %v2111_v53 = vunpack.i.l.bf16 %v2110_v41  ;;  %v1251_v40 = vsel %vm1244_vm3, %v1242_v55, %v2106_v51  ;;  %v1252_v2 = vsel %vm1244_vm3, %v1243_v54, %v2107_v43 }
  0xfc   : > { %v2115_v42 = vpop.permute.xlu1 %2114 }
  0xfd   : > { %v2117_v56 = vunpack.i.h.bf16 %v2115_v42  ;;  %v2116_v58 = vunpack.i.l.bf16 %v2115_v42  ;;  %v1258_v22 = vsel %vm1253_vm4, %v1249_v60, %v2111_v53  ;;  %v1259_v14 = vsel %vm1253_vm4, %v1250_v61, %v2112_v52  ;;  %v1465_v53 = vld [vmem:[%s3019_s4] sm:$0xf] }
  0xfe   : > { %v2120_v10 = vpop.permute.xlu0 %2119  ;;  %1905 = vmatprep.subr.msk.bf16.mxu1 %vm1367_vm1, %v1465_v53 }
  0xff   : > { %v2122_v62 = vunpack.i.h.bf16 %v2120_v10  ;;  %v2121_v1 = vunpack.i.l.bf16 %v2120_v10  ;;  %v1260_v7 = vsel %vm1253_vm4, %v1251_v40, %v2116_v58  ;;  %v1261_v12 = vsel %vm1253_vm4, %v1252_v2, %v2117_v56 }
 0x100   : > { %v2125_v45 = vpop.permute.xlu1 %2124 }
 0x101   : > { %v2127_v4 = vunpack.i.h.bf16 %v2125_v45  ;;  %v2126_v44 = vunpack.i.l.bf16 %v2125_v45  ;;  %v1267_v30 = vsel %vm1262_vm5, %v1258_v22, %v2121_v1  ;;  %v1268_v49 = vsel %vm1262_vm5, %v1259_v14, %v2122_v62 }
 0x102   : > { %v2130_v35 = vpop.permute.xlu0 %2129 }
 0x103   : > { %v2132_v8 = vunpack.i.h.bf16 %v2130_v35  ;;  %v2131_v9 = vunpack.i.l.bf16 %v2130_v35  ;;  %v1269_v20 = vsel %vm1262_vm5, %v1260_v7, %v2126_v44  ;;  %v1270_v21 = vsel %vm1262_vm5, %v1261_v12, %v2127_v4 }
 0x104   : > { %v2135_v11 = vpop.permute.xlu1 %2134 }
 0x105   : > { %v2137_v19 = vunpack.i.h.bf16 %v2135_v11  ;;  %v2136_v25 = vunpack.i.l.bf16 %v2135_v11  ;;  %v1276_v23 = vsel %vm1271_vm6, %v1267_v30, %v2131_v9  ;;  %v1277_v26 = vsel %vm1271_vm6, %v1268_v49, %v2132_v8 }
 0x106   : > { %v2140_v59 = vpop.permute.xlu0 %2139  ;;  %v1486_v11 = vsel %vm1367_vm1, %v1465_v53, 0 }
 0x107   : > { %v2142_v50 = vunpack.i.h.bf16 %v2140_v59  ;;  %v2141_v13 = vunpack.i.l.bf16 %v2140_v59  ;;  %v1278_v27 = vsel %vm1271_vm6, %v1269_v20, %v2136_v25  ;;  %v1279_v28 = vsel %vm1271_vm6, %v1270_v21, %v2137_v19  ;;  %1895 = vmatpush3.bf16.msra.mxu1 %v1486_v11 }
 0x108   : > { %v2145_v3 = vpop.permute.xlu1 %2144 }
 0x109   : > { %v2147_v17 = vunpack.i.h.bf16 %v2145_v3  ;;  %v2146_v18 = vunpack.i.l.bf16 %v2145_v3  ;;  %v1285_v34 = vsel %vm1280_vm7, %v1276_v23, %v2141_v13  ;;  %v1286_v36 = vsel %vm1280_vm7, %v1277_v26, %v2142_v50 }
 0x10a   : > { %v2150_v5 = vpop.permute.xlu0 %2149 }
 0x10b   : > { %v2152_v57 = vunpack.i.h.bf16 %v2150_v5  ;;  %v2151_v63 = vunpack.i.l.bf16 %v2150_v5  ;;  %v1287_v39 = vsel %vm1280_vm7, %v1278_v27, %v2146_v18  ;;  %v1288_v41 = vsel %vm1280_vm7, %v1279_v28, %v2147_v17 }
 0x10c   : > { %v2155_v0 = vpop.permute.xlu1 %2154 }
 0x10d   : > { %v2157_v29 = vunpack.i.h.bf16 %v2155_v0  ;;  %v2156_v32 = vunpack.i.l.bf16 %v2155_v0  ;;  %v1294_v42 = vsel %vm1289_vm8, %v1285_v34, %v2151_v63  ;;  %v1295_v10 = vsel %vm1289_vm8, %v1286_v36, %v2152_v57 }
 0x10e   : > { %v2160_v33 = vpop.permute.xlu0 %2159 }
 0x10f   : > { %v2162_v37 = vunpack.i.h.bf16 %v2160_v33  ;;  %v2161_v38 = vunpack.i.l.bf16 %v2160_v33  ;;  %v1296_v35 = vsel %vm1289_vm8, %v1287_v39, %v2156_v32  ;;  %v1297_v6 = vsel %vm1289_vm8, %v1288_v41, %v2157_v29 }
 0x110   : > { %v2165_v45 = vpop.permute.xlu1 %2164 }
 0x111   : > { %v1303_v46 = vsel %vm1298_vm9, %v1294_v42, %v2161_v38  ;;  %v1304_v47 = vsel %vm1298_vm9, %v1295_v10, %v2162_v37  ;;  %v2167_v31 = vunpack.i.h.bf16 %v2165_v45  ;;  %v2166_v48 = vunpack.i.l.bf16 %v2165_v45 }
 0x112   : > { %v1309_v15 = vpack.c.bf16 %v1304_v47, %v1303_v46 }
 0x113   : > { %v1305_v43 = vsel %vm1298_vm9, %v1296_v35, %v2166_v48  ;;  %v1306_v51 = vsel %vm1298_vm9, %v1297_v6, %v2167_v31 }
 0x114   : > { %v1310_v52 = vpack.c.bf16 %v1306_v51, %v1305_v43  ;;  %1890 = vmatprep.mubr.msk.bf16.mxu0 %vm1354_vm10, %v1309_v15 }
 0x116   : > { %1891 = vmatmul.mubr.msk.bf16.gmra.mxu0 %vm1354_vm10, %v1310_v52 }
 0x1b8   : > { %v1888_v24 = vpop.f32.mrf.mxu0 }
 0x1b9   : > { %v1414_v54 = vadd.f32 %v1888_v24, %v1837_v16 }
 0x1ba   : > { %v1405_v55 = vpop.f32.mrf.mxu0 }
 0x1bb   : > { %v1438_v56 = vmax.f32 %v1414_v54, 0.0  ;;  %v1406_v58 = vadd.f32 %v1837_v16, %v1405_v55 }
 0x1bc   : > { %v1889_v59 = vpop.f32.mrf.mxu0 }
 0x1bd   : > { %v1446_v60 = vpack.c.bf16 %v1438_v56, %v1438_v56  ;;  %v1436_v61 = vmax.f32 %v1406_v58, 0.0  ;;  %v1417_v62 = vadd.f32 %v1889_v59, %v1837_v16 }
 0x1be   : > { %v1408_v1 = vpop.f32.mrf.mxu0 }
 0x1bf   : > { %1455 = vst.msk [vmem:[%s2877_s17 + $0x8] sm:$0xf] %vm1452_vm11, %v1446_v60  ;;  %v1444_v40 = vpack.c.bf16 %v1436_v61, %v1436_v61  ;;  %v1439_v2 = vmax.f32 %v1417_v62, 0.0  ;;  %v1409_v22 = vadd.f32 %v1837_v16, %v1408_v1 }
 0x1c1   : > { %1453 = vst.msk [vmem:[%s2877_s17] sm:$0xf] %vm1452_vm11, %v1444_v40  ;;  %v1447_v14 = vpack.c.bf16 %v1439_v2, %v1439_v2  ;;  %v1437_v3 = vmax.f32 %v1409_v22, 0.0  ;;  %v1462_v8 = vpack.c.bf16 %v1439_v2, %v1438_v56 }
 0x1c3   : > { %1456 = vst.msk [vmem:[%s2877_s17 + $0xc] sm:$0xf] %vm1452_vm11, %v1447_v14  ;;  %v1445_v4 = vpack.c.bf16 %v1437_v3, %v1437_v3  ;;  %v1461_v44 = vpack.c.bf16 %v1437_v3, %v1436_v61 }
 0x1c5   : > { %1454 = vst.msk [vmem:[%s2877_s17 + $0x4] sm:$0xf] %vm1452_vm11, %v1445_v4  ;;  %1896 = vmatprep.mubr.msk.bf16.mxu1 %vm1235_vm2, %v1461_v44 }
 0x1c6   : > { %1897 = vmatmul.mubr.msk.bf16.vlgmr.msra.gmra.mxu1 %vm1235_vm2, %v1462_v8 }
 0x1d6   : > { %v1892_v9 = vpop.f32.mrf.mxu0 }
 0x1d7   : > { %v1430_v7 = vadd.f32 %v1892_v9, %v1837_v16 }
 0x1d8   : > { %v1421_v12 = vpop.f32.mrf.mxu0 }
 0x1d9   : > { %v1442_v19 = vmax.f32 %v1430_v7, 0.0  ;;  %v1422_v25 = vadd.f32 %v1837_v16, %v1421_v12 }
 0x1da   : > { %v1893_v5 = vpop.f32.mrf.mxu0 }
 0x1db   : > { %v1450_v30 = vpack.c.bf16 %v1442_v19, %v1442_v19  ;;  %v1440_v49 = vmax.f32 %v1422_v25, 0.0  ;;  %v1433_v50 = vadd.f32 %v1893_v5, %v1837_v16 }
 0x1dc   : > { %v1424_v13 = vpop.f32.mrf.mxu0 }
 0x1dd   : > { %1459 = vst.msk [vmem:[%s2877_s17 + $0x18] sm:$0xf] %vm1452_vm11, %v1450_v30  ;;  %v1448_v17 = vpack.c.bf16 %v1440_v49, %v1440_v49  ;;  %v1443_v18 = vmax.f32 %v1433_v50, 0.0  ;;  %v1425_v57 = vadd.f32 %v1837_v16, %v1424_v13 }
 0x1df   : > { %1457 = vst.msk [vmem:[%s2877_s17 + $0x10] sm:$0xf] %vm1452_vm11, %v1448_v17  ;;  %v1451_v63 = vpack.c.bf16 %v1443_v18, %v1443_v18  ;;  %v1441_v0 = vmax.f32 %v1425_v57, 0.0  ;;  %v1464_v23 = vpack.c.bf16 %v1443_v18, %v1442_v19 }
 0x1e1   : > { %1460 = vst.msk [vmem:[%s2877_s17 + $0x1c] sm:$0xf] %vm1452_vm11, %v1451_v63  ;;  %v1449_v20 = vpack.c.bf16 %v1441_v0, %v1441_v0  ;;  %v1463_v21 = vpack.c.bf16 %v1441_v0, %v1440_v49 }
 0x1e3   : > { %1458 = vst.msk [vmem:[%s2877_s17 + $0x14] sm:$0xf] %vm1452_vm11, %v1449_v20  ;;  %1900 = vmatprep.mubr.msk.bf16.mxu1 %vm1235_vm2, %v1463_v21  ;;  %s2179_s17 = scalar_lea.vmem %s2178_s16, 1024 }
 0x1e4   : > { %1901 = vmatmul.mubr.msk.bf16.gmra.mxu1 %vm1235_vm2, %v1464_v23  ;;  %p2181_p6 = scmp.lt.s32.totalorder %s2179_s17, %s2173_s8 }
 0x1e6   : > { %p2182_p7 = por %p2181_p6, %p2180_p4 }
 0x1e8   : > { %p2183_p8 = pnand %p2182_p7, %p2176_p3 }
 0x1ea   : > { %2186 = shalt.err (!%p2183_p8)
}
 0x1eb   : > { %s2187_s13 = scalar_lea.hbm %s2908_s21, 512  ;;  %s2191_s10 = scalar_lea.hbm %s3021_s6, 1024 }
 0x1ec   : > { %p2188_p11 = scmp.ne.s32.totalorder %s2908_s21, %s2187_s13  ;;  %p2192_p0 = scmp.lt.s32.totalorder %s2908_s21, %s3021_s6 }
 0x1ed   : > { %p2193_p1 = scmp.lt.s32.totalorder %s2191_s10, %s2187_s13 }
 0x1ee   : > { %p2189_p12 = pnand %p2188_p11, %p2395_p5 }
 0x1ef   : > { %p2194_p2 = por %p2193_p1, %p2192_p0 }
 0x1f0   : > { %p2190_p13 = pneg %p2189_p12 }
 0x1f2   : > { %p2195_p3 = pnand %p2194_p2, %p2190_p13 }
 0x1f4   : > { %2198 = shalt.err (!%p2195_p3)
}
 0x1f5   : > { %s3028_s8 = smov 4   ;;  %s3033_s16 = smov 64   ;;  %v1847_v26 = vld [vmem:[%s3020_s5] ss:$0 sm:$0xff]  ;;  %vm1561_vm12 = vcmask 125952  }
 0x1f6   : > { %s3034_s17 = scalar_lea.sflag [#allocation5], %s2570_s11  ;;  %s2940_s18 = scalar_lea.vmem [#allocation6], %s2747_s22 }
 0x1f7   : > { %1907 = dma.vmem_to_hbm [thread:$0]  (%p2395_p5), %s2900_s19, 512, %s2908_s21, %s3034_s17, %s3033_s16, %s3033_s16, %s3028_s8  }
 0x1f8   : > { %s1609_s22 = sshll.u32 %s2940_s18, 4  ;;  %s3035_s19 = sshll.u32 %s2287_s27, 9  ;;  %s2955_s22 = int_to_ptr.vmem [resolvable:$true] %s1609_s22 }
 0x1f9   : > { %s2964_s13 = scalar_lea.hbm %s3022_s7, %s3035_s19  ;;  %s1576_s10 = scalar_lea.sflag [#allocation7], %s2570_s11 }
 0x1fa   : > { %s2199_s17 = scalar_lea.vmem %s2955_s22, 512  ;;  %s2311_s20 = smov [#allocation6]  }
 0x1fb   : > { %p2200_p4 = scmp.ne.s32.totalorder %s2955_s22, %s2199_s17  ;;  %s2203_s23 = sshll.u32 %s2311_s20, 4  ;;  %s2204_s23 = int_to_ptr.vmem [resolvable:$false] %s2203_s23 }
 0x1fc   : > { %s2205_s8 = scalar_lea.vmem %s2204_s23, 1024  ;;  %p2206_p8 = scmp.lt.s32.totalorder %s2955_s22, %s2204_s23 }
 0x1fd   : > { %p2201_p6 = pnand %p2200_p4, %p2395_p5  ;;  %p2207_p11 = scmp.lt.s32.totalorder %s2205_s8, %s2199_s17 }
 0x1ff   : > { %p2202_p7 = pneg %p2201_p6  ;;  %p2208_p12 = por %p2207_p11, %p2206_p8 }
 0x201   : > { %p2209_p13 = pnand %p2208_p12, %p2202_p7 }
 0x286   : > { %v1898_v27 = vpop.f32.mrf.mxu1 }
 0x287   : > { %v1531_v28 = vadd.f32 %v1898_v27, %v1847_v26 }
 0x288   : > { %v1522_v29 = vpop.f32.mrf.mxu1 }
 0x289   : > { %v1555_v32 = vpack.c.bf16 %v1531_v28, %v1531_v28  ;;  %v1523_v33 = vadd.f32 %v1847_v26, %v1522_v29 }
 0x28a   : > { %v1899_v34 = vpop.f32.mrf.mxu1 }
 0x28b   : > { %1564 = vst.msk [vmem:[%s2940_s18 + $0x8] sm:$0xf] %vm1561_vm12, %v1555_v32  ;;  %v1553_v36 = vpack.c.bf16 %v1523_v33, %v1523_v33  ;;  %v1534_v37 = vadd.f32 %v1899_v34, %v1847_v26 }
 0x28c   : > { %v1525_v38 = vpop.f32.mrf.mxu1 }
 0x28d   : > { %1562 = vst.msk [vmem:[%s2940_s18] sm:$0xf] %vm1561_vm12, %v1553_v36  ;;  %v1556_v39 = vpack.c.bf16 %v1534_v37, %v1534_v37  ;;  %v1526_v41 = vadd.f32 %v1847_v26, %v1525_v38 }
 0x28f   : > { %1565 = vst.msk [vmem:[%s2940_s18 + $0xc] sm:$0xf] %vm1561_vm12, %v1556_v39  ;;  %v1554_v42 = vpack.c.bf16 %v1526_v41, %v1526_v41 }
 0x291   : > { %1563 = vst.msk [vmem:[%s2940_s18 + $0x4] sm:$0xf] %vm1561_vm12, %v1554_v42 }
 0x2a4   : > { %v1902_v10 = vpop.f32.mrf.mxu1 }
 0x2a5   : > { %v1547_v45 = vadd.f32 %v1902_v10, %v1847_v26 }
 0x2a6   : > { %v1538_v46 = vpop.f32.mrf.mxu1 }
 0x2a7   : > { %v1559_v47 = vpack.c.bf16 %v1547_v45, %v1547_v45  ;;  %v1539_v31 = vadd.f32 %v1847_v26, %v1538_v46 }
 0x2a8   : > { %v1903_v48 = vpop.f32.mrf.mxu1 }
 0x2a9   : > { %1568 = vst.msk [vmem:[%s2940_s18 + $0x18] sm:$0xf] %vm1561_vm12, %v1559_v47  ;;  %v1557_v35 = vpack.c.bf16 %v1539_v31, %v1539_v31  ;;  %v1550_v6 = vadd.f32 %v1903_v48, %v1847_v26 }
 0x2aa   : > { %v1541_v15 = vpop.f32.mrf.mxu1 }
 0x2ab   : > { %1566 = vst.msk [vmem:[%s2940_s18 + $0x10] sm:$0xf] %vm1561_vm12, %v1557_v35  ;;  %v1560_v43 = vpack.c.bf16 %v1550_v6, %v1550_v6  ;;  %v1542_v51 = vadd.f32 %v1847_v26, %v1541_v15 }
 0x2ad   : > { %1569 = vst.msk [vmem:[%s2940_s18 + $0x1c] sm:$0xf] %vm1561_vm12, %v1560_v43  ;;  %v1558_v52 = vpack.c.bf16 %v1542_v51, %v1542_v51 }
 0x2af   : > { %1567 = vst.msk [vmem:[%s2940_s18 + $0x14] sm:$0xf] %vm1561_vm12, %v1558_v52 }
 0x2b0   : > { %2212 = shalt.err (!%p2209_p13)
}
 0x2b1   : > { %s2213_s27 = scalar_lea.hbm %s2964_s13, 512  ;;  %s2217_s19 = scalar_lea.hbm %s3022_s7, 1024 }
 0x2b2   : > { %p2214_p0 = scmp.ne.s32.totalorder %s2964_s13, %s2213_s27  ;;  %p2218_p3 = scmp.lt.s32.totalorder %s2964_s13, %s3022_s7 }
 0x2b3   : > { %p2219_p4 = scmp.lt.s32.totalorder %s2217_s19, %s2213_s27 }
 0x2b4   : > { %p2215_p1 = pnand %p2214_p0, %p2395_p5 }
 0x2b5   : > { %p2220_p6 = por %p2219_p4, %p2218_p3 }
 0x2b6   : > { %p2216_p2 = pneg %p2215_p1 }
 0x2b8   : > { %p2221_p7 = pnand %p2220_p6, %p2216_p2 }
 0x2ba   : > { %2224 = shalt.err (!%p2221_p7)
}
 0x2bb   : > { %s3036_s8 = smov 4  }
 0x2bc   : > { %1908 = dma.vmem_to_hbm [thread:$0]  (%p2395_p5), %s2955_s22, 512, %s2964_s13, %s1576_s10, %s3033_s16, %s3033_s16, %s3036_s8  }
 0x2bd PF: > { %s1624_s17 = sand.u32 1, %s2275_s24   ;;  %p1912_p8 = pnand %p1811_p10, %p2406_p9 }
 0x2be   : > { %s1625_s20 = scalar_lea.sflag [#allocation5], %s1624_s17 }
 0x2bf   : > { %p1913_p11 = pneg %p1912_p8 }
 0x2c1   : > { %2266 = dma.done.wait (%p1913_p11), %s1625_s20, 512  }
 0x2c2   : > { %2268 = vsyncadd (%p1913_p11), %s1625_s20, 4294966784  ;;  %s1634_s23 = scalar_lea.sflag [#allocation7], %s1624_s17 }
 0x2c3   : > { %2270 = dma.done.wait (%p1913_p11), %s1634_s23, 512  }
 0x2c4   : > { %2272 = vsyncadd (%p1913_p11), %s1634_s23, 4294966784  ;;  %s24_s29 = sadd.s32 1, %s2295_s29   ;;  %s3037_s24 = smov %s2279_s25 }
 0x2c5   : > { %p21_p12 = scmp.ge.s32.totalorder %s24_s29, 4   ;;  %s3038_s25 = smov %s2283_s26 }
 0x2c6   : > { %s3039_s26 = smov %s2404_s14  ;;  %s3040_s27 = smov %s2291_s28 }
 0x2c7   : > { %s3041_s28 = smov %s3043_s9  ;;  %23 = sbr.rel (!%p21_p12) target bundleno = 6 (0x6), region = 248 }
 0x2cc   :  { %1639 = vsyncpa [#allocation5], 1 }
 0x2cd   :  { %1641 = vsyncpa [#allocation5 + $0x1], 1 }
 0x2ce   :  { %1642 = vsyncpa [#allocation7], 1 }
 0x2cf   :  { %1644 = vsyncpa [#allocation7 + $0x1], 1 }

</bundles_post_ra>
